<compile_context>
chip_gen: v5e
topology: v5e:2x2
jax: 0.10.0
libtpu: 0.0.40
codegen_flags: <defaults>
</compile_context>

<pallas_src>
import math
import numpy as np
import jax
import jax.numpy as jnp
from jax.experimental import pallas as pl
from jax.experimental.pallas import tpu as pltpu


def _build_tap_masks(H, W):
    """(9, H*W) f32 validity masks for the 3x3 taps (zero padding at borders).

    Tap order t = (di+1)*3 + (dj+1), di/dj in {-1,0,1}; mask[t, h*W+w] == 1 iff
    (h+di, w+dj) is inside the image.  Every lane-roll wraparound / cross-row
    lane in the flat layout is exactly one of these invalid positions.
    """
    P = H * W
    hh, ww = np.meshgrid(np.arange(H), np.arange(W), indexing="ij")
    hh = hh.reshape(-1)
    ww = ww.reshape(-1)
    m = np.zeros((9, P), np.float32)
    t = 0
    for di in (-1, 0, 1):
        for dj in (-1, 0, 1):
            ok = (hh + di >= 0) & (hh + di < H) & (ww + dj >= 0) & (ww + dj < W)
            m[t] = ok.astype(np.float32)
            t += 1
    return m


def _make_pa_kernel(C, H, W):
    P = H * W
    taps = [(di, dj) for di in (-1, 0, 1) for dj in (-1, 0, 1)]

    def pa_kernel(x_ref, w1_ref, w2_ref, m_ref, o_ref):
        # x_ref : (1, C, P)   one whole image, lane-dense (P multiple of 128)
        # w1_ref: (C, C)      1x1-conv weight, bf16 (MXU-native operand)
        # w2_ref: (C, 9)      depthwise 3x3 taps, f32
        # m_ref : (9, P)      border-validity masks, f32 (shared across grid)
        # o_ref : (1, C, P)
        x = x_ref[0]                                               # (C, P) f32

        # ---- gate = sigmoid(1x1 conv): ONE bf16 MXU matmul over all channels
        #      (f32 accumulate); sigmoid via the tanh identity so it stays on
        #      the EUP instead of an f32 VALU divide.
        pre = jnp.dot(w1_ref[...], x.astype(jnp.bfloat16),
                      preferred_element_type=jnp.float32)          # (C, P)
        gate = 0.5 * (jnp.tanh(0.5 * pre) + 1.0)

        # ---- depthwise 3x3 conv directly on the flat layout:
        #      8 XLU lane-rolls + masked VPU multiply-adds.  Kept in f32 so the
        #      same code is right for v5e; use bf16 here for v6e/v7x-only builds.
        w2 = w2_ref[...]                                           # (C, 9)
        masks = m_ref[...]                                         # (9, P)

        acc = w2[:, 4:5] * x                                       # center tap
        for t, (di, dj) in enumerate(taps):
            if di == 0 and dj == 0:
                continue
            k = di * W + dj                                        # flat offset
            # sh[:, p] = x[:, (p + k) % P]; rotate amount is canonical mod P
            # (single XLU rotate either way); wrapped / cross-row lanes are
            # zeroed by the precomputed mask.
            sh = pltpu.roll(x, (-k) % P, 1) * masks[t:t + 1, :]
            acc = acc + w2[:, t:t + 1] * sh

        o_ref[0] = (gate * acc).astype(o_ref.dtype)

    return pa_kernel


def pa_forward(x, w1, w2):
    """out = sigmoid(conv1x1(x; w1)) * depthwise_conv3x3(x; w2, padding=1).

    x: (N, C, H, W); w1: (C, C) [= torch conv1.weight[:, :, 0, 0]];
    w2: (C, 3, 3) [= torch conv2.weight[:, 0]]. Bias-free (module default).
    """
    N, C, H, W = x.shape
    P = H * W
    assert C % 8 == 0, "channel count must be a multiple of 8 sublanes"

    x_flat = x.reshape(N, C, P)                       # free row-major reshape
    w1_b = w1.astype(jnp.bfloat16)                    # MXU-native, halves DMA
    w2_f = w2.reshape(C, 9).astype(jnp.float32)
    masks = jnp.asarray(_build_tap_masks(H, W))

    # Scoped-VMEM: only override when the resident blocks actually get big
    # (double-buffered x/out blocks + weights/masks + intermediate headroom).
    blk = C * P * 4
    vmem_need = 4 * blk + 2 * (C * C * 2 + C * 9 * 4 + 9 * P * 4) + 6 * blk
    vmem_limit = None
    if vmem_need > 24 * 1024 * 1024:
        # TODO(synk): replace with row-halo spatial tiling of P for very large
        # images (v7x has only 64 MiB physical VMEM).
        vmem_limit = int(min(vmem_need, 60 * 1024 * 1024))

    flops = 2 * N * C * C * P + 3 * 9 * N * C * P + N * C * P
    bytes_accessed = 4 * (2 * N * C * P + 9 * P + C * 9) + 2 * C * C

    out_flat = pl.pallas_call(
        _make_pa_kernel(C, H, W),
        out_shape=jax.ShapeDtypeStruct((N, C, P), x.dtype),
        grid=(N,),
        in_specs=[
            pl.BlockSpec((1, C, P), lambda n: (n, 0, 0)),   # one image per step
            pl.BlockSpec((C, C), lambda n: (0, 0)),         # weights resident
            pl.BlockSpec((C, 9), lambda n: (0, 0)),
            pl.BlockSpec((9, P), lambda n: (0, 0)),
        ],
        out_specs=pl.BlockSpec((1, C, P), lambda n: (n, 0, 0)),
        compiler_params=pltpu.CompilerParams(
            dimension_semantics=("parallel",),
            vmem_limit_bytes=vmem_limit),
        cost_estimate=pl.CostEstimate(
            flops=flops, transcendentals=N * C * P,
            bytes_accessed=bytes_accessed),
    )(x_flat, w1_b, w2_f, masks)
    return out_flat.reshape(N, C, H, W)


class PAPallas:
    """Pallas equivalent of the PyTorch PA module (groups='depthwise', bias=False)."""

    def __init__(self, channels=64, chanfactor=4, groups="depthwise", bias=False,
                 key=None):
        if groups != "depthwise" or bias:
            # TODO(synk): groups='standard' (dense 3x3 conv) and bias=True paths
            # are not implemented; the module defaults are depthwise / bias-free.
            raise NotImplementedError("only groups='depthwise', bias=False supported")
        self.channels = channels
        key = jax.random.PRNGKey(0) if key is None else key
        k1, k2 = jax.random.split(key)
        # PyTorch Conv2d default init: kaiming_uniform(a=sqrt(5)) -> U(-1/sqrt(fan_in), +)
        b1 = 1.0 / math.sqrt(channels)                # conv1 fan_in = C * 1 * 1
        self.w1 = jax.random.uniform(k1, (channels, channels), jnp.float32, -b1, b1)
        b2 = 1.0 / math.sqrt(9.0)                     # conv2 (depthwise) fan_in = 9
        self.w2 = jax.random.uniform(k2, (channels, 3, 3), jnp.float32, -b2, b2)

    def __call__(self, x):
        return pa_forward(x, self.w1, self.w2)


def _reference(x, w1, w2):
    """Pure-JAX f32 reference with the module's math (highest precision)."""
    N, C, H, W = x.shape
    out1 = jax.nn.sigmoid(jnp.einsum("oc,nchw->nohw", w1, x, precision="highest"))
    xp = jnp.pad(x, ((0, 0), (0, 0), (1, 1), (1, 1)))
    out2 = jnp.zeros_like(x)
    for i in range(3):
        for j in range(3):
            out2 = out2 + w2[None, :, i, j, None, None] * xp[:, :, i:i + H, j:j + W]
    return out1 * out2


if __name__ == "__main__":
    key = jax.random.PRNGKey(0)
    k_x, k_p = jax.random.split(key)

    # batch=2, channels=64 (module default), spatial 16x16
    x = jax.random.normal(k_x, (2, 64, 16, 16), jnp.float32)
    model = PAPallas(channels=64, chanfactor=4, groups="depthwise", bias=False, key=k_p)

    y = model(x)
    y = jax.block_until_ready(y)
    assert y.shape == (2, 64, 16, 16), y.shape

    y_ref = _reference(x, model.w1, model.w2)
    err = float(jnp.max(jnp.abs(y - y_ref)))
    # bf16 MXU operands on the 1x1 conv => slightly looser tolerance than pure f32.
    assert jnp.allclose(y, y_ref, atol=1e-2, rtol=1e-2), err

    print("KERNEL_OK")
</pallas_src>

<mosaic_0001>
module attributes {stable_mosaic.version = 11 : i64} {
  func.func @pa_kernel(%arg0: i32, %arg1: memref<1x64x256xf32, #tpu.memory_space<vmem>>, %arg2: memref<64x64xbf16, #tpu.memory_space<vmem>>, %arg3: memref<64x9xf32, #tpu.memory_space<vmem>>, %arg4: memref<9x256xf32, #tpu.memory_space<vmem>>, %arg5: memref<1x64x256xf32, #tpu.memory_space<vmem>>) attributes {dimension_semantics = [#tpu.dimension_semantics<parallel>], iteration_bounds = array<i64: 2>, scalar_prefetch = 0 : i64, scratch_operands = 0 : i64, tpu.core_type = #tpu.core_type<tc>, window_params = [{transform_indices = @transform_0, window_bounds = array<i64: 1, 64, 256>}, {pipeline_mode = #tpu.pipeline_mode<synchronous>, transform_indices = @transform_1, window_bounds = array<i64: 64, 64>}, {pipeline_mode = #tpu.pipeline_mode<synchronous>, transform_indices = @transform_2, window_bounds = array<i64: 64, 9>}, {pipeline_mode = #tpu.pipeline_mode<synchronous>, transform_indices = @transform_3, window_bounds = array<i64: 9, 256>}, {transform_indices = @transform_4, window_bounds = array<i64: 1, 64, 256>}]} {
    %c0 = arith.constant 0 : index
    %c0_0 = arith.constant 0 : index
    %c0_1 = arith.constant 0 : index
    %0 = vector.load %arg1[%c0, %c0_0, %c0_1] : memref<1x64x256xf32, #tpu.memory_space<vmem>>, vector<1x64x256xf32>
    %1 = vector.shape_cast %0 : vector<1x64x256xf32> to vector<64x256xf32>
    %c0_2 = arith.constant 0 : index
    %c0_3 = arith.constant 0 : index
    %2 = vector.load %arg2[%c0_2, %c0_3] : memref<64x64xbf16, #tpu.memory_space<vmem>>, vector<64x64xbf16>
    %3 = arith.truncf %1 : vector<64x256xf32> to vector<64x256xbf16>
    %cst = arith.constant dense<0.000000e+00> : vector<64x256xf32>
    %4 = tpu.matmul %2, %3, %cst {dimension_numbers = #tpu.dot_dimension_numbers<[1], [0], [0], [1], [0, 0, 1, 1], [], []>} : vector<64x64xbf16>, vector<64x256xbf16>, vector<64x256xf32> -> vector<64x256xf32>
    %cst_4 = arith.constant 5.000000e-01 : f32
    %5 = vector.broadcast %cst_4 : f32 to vector<64x256xf32>
    %6 = arith.mulf %5, %4 : vector<64x256xf32>
    %7 = math.tanh %6 : vector<64x256xf32>
    %cst_5 = arith.constant 1.000000e+00 : f32
    %8 = vector.broadcast %cst_5 : f32 to vector<64x256xf32>
    %9 = arith.addf %7, %8 : vector<64x256xf32>
    %cst_6 = arith.constant 5.000000e-01 : f32
    %10 = vector.broadcast %cst_6 : f32 to vector<64x256xf32>
    %11 = arith.mulf %10, %9 : vector<64x256xf32>
    %c0_7 = arith.constant 0 : index
    %c0_8 = arith.constant 0 : index
    %12 = vector.load %arg3[%c0_7, %c0_8] : memref<64x9xf32, #tpu.memory_space<vmem>>, vector<64x9xf32>
    %c0_9 = arith.constant 0 : index
    %c0_10 = arith.constant 0 : index
    %13 = vector.load %arg4[%c0_9, %c0_10] : memref<9x256xf32, #tpu.memory_space<vmem>>, vector<9x256xf32>
    %14 = vector.extract_strided_slice %12 {offsets = [0, 4], sizes = [64, 1], strides = [1, 1]} : vector<64x9xf32> to vector<64x1xf32>
    %15 = vector.broadcast %14 : vector<64x1xf32> to vector<64x256xf32>
    %16 = arith.mulf %15, %1 : vector<64x256xf32>
    %c17_i32 = arith.constant 17 : i32
    %17 = tpu.dynamic_rotate %1 by %c17_i32 dim 1 : vector<64x256xf32>, i32 -> vector<64x256xf32>
    %18 = vector.extract_strided_slice %13 {offsets = [0, 0], sizes = [1, 256], strides = [1, 1]} : vector<9x256xf32> to vector<1x256xf32>
    %19 = vector.broadcast %18 : vector<1x256xf32> to vector<64x256xf32>
    %20 = arith.mulf %17, %19 : vector<64x256xf32>
    %21 = vector.extract_strided_slice %12 {offsets = [0, 0], sizes = [64, 1], strides = [1, 1]} : vector<64x9xf32> to vector<64x1xf32>
    %22 = vector.broadcast %21 : vector<64x1xf32> to vector<64x256xf32>
    %23 = arith.mulf %22, %20 : vector<64x256xf32>
    %24 = arith.addf %16, %23 : vector<64x256xf32>
    %c16_i32 = arith.constant 16 : i32
    %25 = tpu.dynamic_rotate %1 by %c16_i32 dim 1 : vector<64x256xf32>, i32 -> vector<64x256xf32>
    %26 = vector.extract_strided_slice %13 {offsets = [1, 0], sizes = [1, 256], strides = [1, 1]} : vector<9x256xf32> to vector<1x256xf32>
    %27 = vector.broadcast %26 : vector<1x256xf32> to vector<64x256xf32>
    %28 = arith.mulf %25, %27 : vector<64x256xf32>
    %29 = vector.extract_strided_slice %12 {offsets = [0, 1], sizes = [64, 1], strides = [1, 1]} : vector<64x9xf32> to vector<64x1xf32>
    %30 = vector.broadcast %29 : vector<64x1xf32> to vector<64x256xf32>
    %31 = arith.mulf %30, %28 : vector<64x256xf32>
    %32 = arith.addf %24, %31 : vector<64x256xf32>
    %c15_i32 = arith.constant 15 : i32
    %33 = tpu.dynamic_rotate %1 by %c15_i32 dim 1 : vector<64x256xf32>, i32 -> vector<64x256xf32>
    %34 = vector.extract_strided_slice %13 {offsets = [2, 0], sizes = [1, 256], strides = [1, 1]} : vector<9x256xf32> to vector<1x256xf32>
    %35 = vector.broadcast %34 : vector<1x256xf32> to vector<64x256xf32>
    %36 = arith.mulf %33, %35 : vector<64x256xf32>
    %37 = vector.extract_strided_slice %12 {offsets = [0, 2], sizes = [64, 1], strides = [1, 1]} : vector<64x9xf32> to vector<64x1xf32>
    %38 = vector.broadcast %37 : vector<64x1xf32> to vector<64x256xf32>
    %39 = arith.mulf %38, %36 : vector<64x256xf32>
    %40 = arith.addf %32, %39 : vector<64x256xf32>
    %c1_i32 = arith.constant 1 : i32
    %41 = tpu.dynamic_rotate %1 by %c1_i32 dim 1 : vector<64x256xf32>, i32 -> vector<64x256xf32>
    %42 = vector.extract_strided_slice %13 {offsets = [3, 0], sizes = [1, 256], strides = [1, 1]} : vector<9x256xf32> to vector<1x256xf32>
    %43 = vector.broadcast %42 : vector<1x256xf32> to vector<64x256xf32>
    %44 = arith.mulf %41, %43 : vector<64x256xf32>
    %45 = vector.extract_strided_slice %12 {offsets = [0, 3], sizes = [64, 1], strides = [1, 1]} : vector<64x9xf32> to vector<64x1xf32>
    %46 = vector.broadcast %45 : vector<64x1xf32> to vector<64x256xf32>
    %47 = arith.mulf %46, %44 : vector<64x256xf32>
    %48 = arith.addf %40, %47 : vector<64x256xf32>
    %c255_i32 = arith.constant 255 : i32
    %49 = tpu.dynamic_rotate %1 by %c255_i32 dim 1 : vector<64x256xf32>, i32 -> vector<64x256xf32>
    %50 = vector.extract_strided_slice %13 {offsets = [5, 0], sizes = [1, 256], strides = [1, 1]} : vector<9x256xf32> to vector<1x256xf32>
    %51 = vector.broadcast %50 : vector<1x256xf32> to vector<64x256xf32>
    %52 = arith.mulf %49, %51 : vector<64x256xf32>
    %53 = vector.extract_strided_slice %12 {offsets = [0, 5], sizes = [64, 1], strides = [1, 1]} : vector<64x9xf32> to vector<64x1xf32>
    %54 = vector.broadcast %53 : vector<64x1xf32> to vector<64x256xf32>
    %55 = arith.mulf %54, %52 : vector<64x256xf32>
    %56 = arith.addf %48, %55 : vector<64x256xf32>
    %c241_i32 = arith.constant 241 : i32
    %57 = tpu.dynamic_rotate %1 by %c241_i32 dim 1 : vector<64x256xf32>, i32 -> vector<64x256xf32>
    %58 = vector.extract_strided_slice %13 {offsets = [6, 0], sizes = [1, 256], strides = [1, 1]} : vector<9x256xf32> to vector<1x256xf32>
    %59 = vector.broadcast %58 : vector<1x256xf32> to vector<64x256xf32>
    %60 = arith.mulf %57, %59 : vector<64x256xf32>
    %61 = vector.extract_strided_slice %12 {offsets = [0, 6], sizes = [64, 1], strides = [1, 1]} : vector<64x9xf32> to vector<64x1xf32>
    %62 = vector.broadcast %61 : vector<64x1xf32> to vector<64x256xf32>
    %63 = arith.mulf %62, %60 : vector<64x256xf32>
    %64 = arith.addf %56, %63 : vector<64x256xf32>
    %c240_i32 = arith.constant 240 : i32
    %65 = tpu.dynamic_rotate %1 by %c240_i32 dim 1 : vector<64x256xf32>, i32 -> vector<64x256xf32>
    %66 = vector.extract_strided_slice %13 {offsets = [7, 0], sizes = [1, 256], strides = [1, 1]} : vector<9x256xf32> to vector<1x256xf32>
    %67 = vector.broadcast %66 : vector<1x256xf32> to vector<64x256xf32>
    %68 = arith.mulf %65, %67 : vector<64x256xf32>
    %69 = vector.extract_strided_slice %12 {offsets = [0, 7], sizes = [64, 1], strides = [1, 1]} : vector<64x9xf32> to vector<64x1xf32>
    %70 = vector.broadcast %69 : vector<64x1xf32> to vector<64x256xf32>
    %71 = arith.mulf %70, %68 : vector<64x256xf32>
    %72 = arith.addf %64, %71 : vector<64x256xf32>
    %c239_i32 = arith.constant 239 : i32
    %73 = tpu.dynamic_rotate %1 by %c239_i32 dim 1 : vector<64x256xf32>, i32 -> vector<64x256xf32>
    %74 = vector.extract_strided_slice %13 {offsets = [8, 0], sizes = [1, 256], strides = [1, 1]} : vector<9x256xf32> to vector<1x256xf32>
    %75 = vector.broadcast %74 : vector<1x256xf32> to vector<64x256xf32>
    %76 = arith.mulf %73, %75 : vector<64x256xf32>
    %77 = vector.extract_strided_slice %12 {offsets = [0, 8], sizes = [64, 1], strides = [1, 1]} : vector<64x9xf32> to vector<64x1xf32>
    %78 = vector.broadcast %77 : vector<64x1xf32> to vector<64x256xf32>
    %79 = arith.mulf %78, %76 : vector<64x256xf32>
    %80 = arith.addf %72, %79 : vector<64x256xf32>
    %81 = arith.mulf %11, %80 : vector<64x256xf32>
    %c0_11 = arith.constant 0 : index
    %c0_12 = arith.constant 0 : index
    %c0_13 = arith.constant 0 : index
    %82 = vector.load %arg5[%c0_11, %c0_12, %c0_13] : memref<1x64x256xf32, #tpu.memory_space<vmem>>, vector<1x64x256xf32>
    %83 = vector.shape_cast %82 : vector<1x64x256xf32> to vector<64x256xf32>
    %84 = vector.shape_cast %81 : vector<64x256xf32> to vector<1x64x256xf32>
    tpu.vector_store %arg5[%c0_11, %c0_12, %c0_13], %84 {strides = array<i32>} : memref<1x64x256xf32, #tpu.memory_space<vmem>>, vector<1x64x256xf32>,
    return
  }
  func.func @transform_0(%arg0: i32) -> (i32, i32, i32) {
    %c0_i32 = arith.constant 0 : i32
    %c0_i32_0 = arith.constant 0 : i32
    %c0_i32_1 = arith.constant 0 : i32
    return %arg0, %c0_i32, %c0_i32_0 : i32, i32, i32
  }
  func.func @transform_1(%arg0: i32) -> (i32, i32) {
    %c0_i32 = arith.constant 0 : i32
    %c0_i32_0 = arith.constant 0 : i32
    %c0_i32_1 = arith.constant 0 : i32
    return %c0_i32, %c0_i32_0 : i32, i32
  }
  func.func @transform_2(%arg0: i32) -> (i32, i32) {
    %c0_i32 = arith.constant 0 : i32
    %c0_i32_0 = arith.constant 0 : i32
    %c0_i32_1 = arith.constant 0 : i32
    return %c0_i32, %c0_i32_0 : i32, i32
  }
  func.func @transform_3(%arg0: i32) -> (i32, i32) {
    %c0_i32 = arith.constant 0 : i32
    %c0_i32_0 = arith.constant 0 : i32
    %c0_i32_1 = arith.constant 0 : i32
    return %c0_i32, %c0_i32_0 : i32, i32
  }
  func.func @transform_4(%arg0: i32) -> (i32, i32, i32) {
    %c0_i32 = arith.constant 0 : i32
    %c0_i32_0 = arith.constant 0 : i32
    %c0_i32_1 = arith.constant 0 : i32
    return %arg0, %c0_i32, %c0_i32_0 : i32, i32, i32
  }
}

</mosaic_0001>

<bundles_post_ra>
// kernel: tpu_custom_call.1
= control target key start
LH: loop header
LB: loop body
LE: loop exit
PB: predicated region body
PF: predicated region fallthrough
CT: control target
= control target key end

     0   :  { %9 = vsyncpa [#allocation3], 0  ;;  %s3831_s0 = inlined_call_operand.hbm [shape: f32[2,64,256], index: 0, kind: input, shape index: {}]   ;;  %s3832_s1 = inlined_call_operand.vmem [shape: bf16[64,64], index: 1, kind: input, shape index: {}]   ;;  %s3833_s2 = inlined_call_operand.vmem [shape: f32[64,9], index: 2, kind: input, shape index: {}]   ;;  %s3834_s3 = inlined_call_operand.vmem [shape: f32[9,256], index: 3, kind: input, shape index: {}]   ;;  %s3835_s4 = inlined_call_operand.hbm [shape: f32[2,64,256], index: 4, kind: output, shape index: {}]  }
   0x1   :  { %11 = vsyncpa [#allocation3 + $0x1], 0 }
   0x2   :  { %12 = vsyncpa [#allocation4], 0 }
   0x3   :  { %14 = vsyncpa [#allocation4 + $0x1], 0  ;;  %s1993_s15 = smov 0   ;;  %s1995_s16 = smov 0  }
   0x4   :  { %s1997_s17 = smov 0   ;;  %s1999_s18 = smov 0  }
   0x5 LB: > { %s2014_s19 = sadd.s32 4294967295, %s1946_s18   ;;  %s1645_s20 = sadd.s32 4294967294, %s1946_s18   ;;  %s1946_s18 = sphi %s1999_s18, %s4019_s18   ;;  %s1942_s17 = sphi %s1997_s17, %s4018_s17   ;;  %s1938_s16 = sphi %s1995_s16, %s4017_s16   ;;  %s1934_s15 = sphi %s1993_s15, %s4016_s15  }
   0x6   : > { %s2018_s21 = sadd.s32 1, %s1946_s18   ;;  %s27_s22 = sadd.s32 1, %s1942_s17 }
   0x7   : > { %s24_s23 = ssub.s32 %s1946_s18, %s2018_s21  ;;  %p34_p0 = scmp.ne.s32.totalorder %s1942_s17, %s1938_s16 }
   0x8   : > { %p25_p1 = scmp.eq.s32.totalorder %s24_s23, 0  ;;  %p35_p2 = scmp.eq.s32.totalorder %s1946_s18, 0 }
   0x9   : > { %p40_p3 = scmp.ne.s32.totalorder %s1938_s16, %s1934_s15  ;;  %p41_p4 = scmp.eq.s32.totalorder %s2014_s19, 0 }
   0xa   : > { %s2030_s24 = scalar_select %p25_p1, %s1942_s17, %s27_s22  }
   0xb   : > { %p2032_p5 = por %p35_p2, %p34_p0  ;;  %p2036_p6 = por %p41_p4, %p40_p3 }
   0xc   : > { %p127_p7 = scmp.eq.s32.totalorder %s2014_s19, 1  ;;  %p133_p8 = scmp.eq.s32.totalorder %s1645_s20, 1 }
   0xd   : > { %p1709_p10 = scmp.lt.s32.totalorder %s1946_s18, 2  ;;  %s162_s29 = sand.u32 1, %s1942_s17  }
   0xe   : > { %p2043_p11 = por %p127_p7, %p34_p0  ;;  %p2047_p12 = por %p133_p8, %p40_p3 }
   0xf   : > { %s1683_s30 = sshll.u32 %s1946_s18, 7  ;;  %s1648_s5 = sshll.u32 %s162_s29, 7 }
  0x10   : > { %s171_s8 = scalar_lea.hbm %s3831_s0, %s1683_s30  ;;  %s166_s10 = scalar_lea.vmem [#allocation2], %s1648_s5 }
  0x11   : > { %s172_s9 = sshll.u32 %s171_s8, 4  ;;  %s174_s11 = sshll.u32 %s166_s10, 4  ;;  %s173_s9 = int_to_ptr.hbm [resolvable:$true] %s172_s9  ;;  %s175_s11 = int_to_ptr.vmem [resolvable:$true] %s174_s11 }
  0x12   : > { %p2058_p13 = pnand %p1709_p10, %p2032_p5  ;;  %p1651_p0 = scmp.ge.s32.totalorder %s1946_s18, 1 }
  0x13   : > { %p182_p1 = scmp.lt.s32.totalorder %s1946_s18, 3  ;;  %s163_s13 = scalar_lea.sflag [#allocation3], %s162_s29 }
  0x14   : > { %s1850_s14 = sshra.s32 %s173_s9, 4  ;;  %p1854_p3 = pneg %p2058_p13  ;;  %s1851_s14 = int_to_ptr.hbm [resolvable:$true] %s1850_s14 }
  0x15   : > { %s1852_s20 = scalar_lea.hbm %s1851_s14, 128  ;;  %s1857_s25 = scalar_lea.hbm %s3831_s0, 256 }
  0x16   : > { %p1853_p2 = scmp.ne.s32.totalorder %s1851_s14, %s1852_s20  ;;  %p1858_p5 = scmp.lt.s32.totalorder %s1851_s14, %s3831_s0 }
  0x17   : > { %p1859_p8 = scmp.lt.s32.totalorder %s1857_s25, %s1852_s20 }
  0x18   : > { %p1855_p4 = pnand %p1854_p3, %p1853_p2 }
  0x19   : > { %p1860_p10 = por %p1859_p8, %p1858_p5 }
  0x1a   : > { %p1856_p7 = pneg %p1855_p4 }
  0x1c   : > { %p1861_p9 = pnand %p1860_p10, %p1856_p7 }
  0x1e   : > { %1864 = shalt.err (!%p1861_p9)
}
  0x1f   : > { %s1948_s29 = smov 256   ;;  %s1949_s6 = smov 16  }
  0x20   : > { %1704 = dma.hbm_to_vmem [thread:$0]  (!%p2058_p13), %s173_s9, 2048, %s175_s11, %s163_s13, %s1948_s29, %s1948_s29, %s1949_s6  }
  0x21   : > { %p183_p2 = pnand %p1651_p0, %p182_p1 }
  0x23   : > { %186 = sbr.rel (%p183_p2) target bundleno = 717 (0x2cd), region = 36 }
  0x28   : > { %s2079_s7 = sand.u32 1, %s1938_s16  }
  0x29   : > { %s1652_s8 = sshll.u32 %s2079_s7, 7  ;;  %s189_s10 = scalar_lea.sflag [#allocation3], %s2079_s7 }
  0x2a   : > { %s2085_s14 = scalar_lea.vmem [#allocation2], %s1652_s8 }
  0x2b   : > { %1925 = dma.done.wait (%p2036_p6), %s189_s10, 2048  }
  0x2c   : > { %1927 = vsyncadd (%p2036_p6), %s189_s10, 4294965248  ;;  %v1950_v0 = vmov 4   ;;  %v2094_v1 = vld [vmem:[%s3833_s2 + $0x20] sm:$0xff]  ;;  %v2099_v2 = vld [vmem:[%s3833_s2 + $0x10] sm:$0xff]  ;;  %s1951_s12 = smov 17   ;;  %v1952_v13 = vmov 0  }
  0x2d   : > { %1765 = vset.pattern.permute.xlu2 %v1950_v0  ;;  %1764 = vset.pattern.permute.xlu1 %v1950_v0  ;;  %3898 = vst [vmem:[#allocation8_spill] sm:$0xff] %v2094_v1  ;;  %v2104_v3 = vld [vmem:[%s3833_s2] sm:$0xff]  ;;  %v2112_v4 = vld [vmem:[%s3833_s2 + $0x28] sm:$0xff]  ;;  %v2117_v5 = vld [vmem:[%s3833_s2 + $0x18] sm:$0xff]  ;;  %s1953_s13 = smov 16   ;;  %v1954_v27 = vmov 1  }
  0x2e   : > { %1763 = vset.pattern.permute.xlu0 %v1950_v0  ;;  %3899 = vst [vmem:[#allocation9_spill] sm:$0xff] %v2104_v3  ;;  %440 = vperm.xlu2 %1765, %v2094_v1   ;;  %v2122_v6 = vld [vmem:[%s3833_s2 + $0x8] sm:$0xff]  ;;  %v2130_v7 = vld [vmem:[%s3833_s2 + $0x38] sm:$0xff]  ;;  %v2133_v8 = vld [vmem:[%s2085_s14] sm:$0xff]  ;;  %s1955_s20 = smov 15   ;;  %v1956_v45 = vmov 2  }
  0x2f   : > { %430 = vperm.xlu1 %1764, %v2099_v2   ;;  %420 = vperm.xlu0 %1763, %v2104_v3   ;;  %3900 = vst [vmem:[#allocation10_spill] sm:$0xff] %v2112_v4  ;;  %v2138_v9 = vld [vmem:[%s3833_s2 + $0x30] sm:$0xff]  ;;  %v2145_v10 = vld [vmem:[%s2085_s14 + $0x20] sm:$0xff]  ;;  %v2175_v17 = vld [vmem:[%s2085_s14 + $0x8] sm:$0xff]  ;;  %s1957_s22 = smov 1   ;;  %s1959_s5 = smov 127  }
  0x30   : > { %3901 = vst [vmem:[#allocation11_spill] sm:$0xff] %v2117_v5  ;;  %v2148_v11 = vld [vmem:[%s2085_s14 + $0x30] sm:$0xff]  ;;  %v2163_v15 = vld [vmem:[%s2085_s14 + $0x60] sm:$0xff]  ;;  %v2178_v18 = vld [vmem:[%s2085_s14 + $0x18] sm:$0xff]  ;;  %s1961_s29 = smov 113   ;;  %s1963_s6 = smov 112  }
  0x31   : > { %3902 = vst [vmem:[#allocation12_spill] sm:$0xff] %v2122_v6  ;;  %v2151_v12 = vld [vmem:[%s2085_s14 + $0x10] sm:$0xff]  ;;  %v2166_v16 = vld [vmem:[%s2085_s14 + $0x40] sm:$0xff]  ;;  %v2190_v20 = vld [vmem:[%s2085_s14 + $0x38] sm:$0xff]  ;;  %vm271_vm5 = vcmask 523264  }
  0x32   : > { %3903 = vst [vmem:[#allocation13_spill] sm:$0xff] %v2133_v8  ;;  %v2160_v14 = vld [vmem:[%s2085_s14 + $0x50] sm:$0xff]  ;;  %v2193_v21 = vld [vmem:[%s2085_s14 + $0x48] sm:$0xff]  ;;  %v2208_v24 = vld [vmem:[%s2085_s14 + $0x78] sm:$0xff] }
  0x33   : > { %3904 = vst [vmem:[#allocation14_spill] sm:$0xff] %v2138_v9  ;;  %v2181_v19 = vld [vmem:[%s2085_s14 + $0x70] sm:$0xff]  ;;  %v2196_v22 = vld [vmem:[%s2085_s14 + $0x28] sm:$0xff]  ;;  %v2211_v25 = vld [vmem:[%s2085_s14 + $0x58] sm:$0xff] }
  0x34   : > { %3905 = vst [vmem:[#allocation15_spill] sm:$0xff] %v2148_v11  ;;  %v2205_v23 = vld [vmem:[%s2085_s14 + $0x68] sm:$0xff] }
  0x35   : > { %3906 = vst [vmem:[#allocation16_spill] sm:$0xff] %v2163_v15 }
  0x36   : > { %445 = vperm.xlu2 %1765, %v2112_v4   ;;  %3907 = vst [vmem:[#allocation17_spill] sm:$0xff] %v2205_v23 }
  0x37   : > { %435 = vperm.xlu1 %1764, %v2117_v5   ;;  %425 = vperm.xlu0 %1763, %v2122_v6   ;;  %3908 = vst [vmem:[#allocation18_spill] sm:$0xff] %v2211_v25 }
  0x3e   : > { %474 = vrot.lane.b32.xlu2 %v2133_v8, %s1951_s12 }
  0x3f   : > { %455 = vperm.xlu1 %1764, %v2130_v7   ;;  %450 = vperm.xlu0 %1763, %v2138_v9  }
  0x40   : > { %1768 = vset.pattern.permute.xlu2 %v1952_v13 }
  0x46   : > { %480 = vrot.lane.b32.xlu2 %v2148_v11, %s1951_s12 }
  0x47   : > { %478 = vrot.lane.b32.xlu1 %v2145_v10, %s1951_s12  ;;  %476 = vrot.lane.b32.xlu0 %v2151_v12, %s1951_s12 }
  0x48   : > { %1767 = vset.pattern.permute.xlu1 %v1952_v13  ;;  %1766 = vset.pattern.permute.xlu0 %v1952_v13 }
  0x4e   : > { %486 = vrot.lane.b32.xlu2 %v2163_v15, %s1951_s12 }
  0x4f   : > { %484 = vrot.lane.b32.xlu1 %v2160_v14, %s1951_s12  ;;  %482 = vrot.lane.b32.xlu0 %v2166_v16, %s1951_s12 }
  0x56   : > { %492 = vrot.lane.b32.xlu2 %v2178_v18, %s1951_s12 }
  0x57   : > { %490 = vrot.lane.b32.xlu1 %v2175_v17, %s1951_s12  ;;  %488 = vrot.lane.b32.xlu0 %v2181_v19, %s1951_s12 }
  0x5e   : > { %498 = vrot.lane.b32.xlu2 %v2193_v21, %s1951_s12 }
  0x5f   : > { %496 = vrot.lane.b32.xlu1 %v2190_v20, %s1951_s12  ;;  %494 = vrot.lane.b32.xlu0 %v2196_v22, %s1951_s12 }
  0x66   : > { %504 = vrot.lane.b32.xlu2 %v2208_v24, %s1951_s12 }
  0x67   : > { %502 = vrot.lane.b32.xlu1 %v2205_v23, %s1951_s12  ;;  %500 = vrot.lane.b32.xlu0 %v2211_v25, %s1951_s12 }
  0x6e   : > { %552 = vperm.xlu2 %1768, %v2099_v2  }
  0x6f   : > { %548 = vperm.xlu1 %1767, %v2122_v6   ;;  %544 = vperm.xlu0 %1766, %v2104_v3  }
  0x76   : > { %560 = vperm.xlu2 %1768, %v2094_v1  }
  0x77   : > { %556 = vperm.xlu1 %1767, %v2117_v5   ;;  %564 = vperm.xlu0 %1766, %v2112_v4  }
  0x7e   : > { %572 = vperm.xlu2 %1768, %v2130_v7  }
  0x7f   : > { %568 = vperm.xlu1 %1767, %v2138_v9   ;;  %607 = vrot.lane.b32.xlu0 %v2133_v8, %s1953_s13 }
  0x80   : > { %1771 = vset.pattern.permute.xlu0 %v1954_v27 }
  0x86   : > { %611 = vrot.lane.b32.xlu2 %v2145_v10, %s1953_s13 }
  0x87   : > { %609 = vrot.lane.b32.xlu1 %v2151_v12, %s1953_s13  ;;  %613 = vrot.lane.b32.xlu0 %v2148_v11, %s1953_s13 }
  0x88   : > { %v2235_v26 = vpop.permute.xlu2 %440  ;;  %1769 = vset.pattern.permute.xlu1 %v1954_v27  ;;  %1770 = vset.pattern.permute.xlu2 %v1954_v27 }
  0x8e   : > { %617 = vrot.lane.b32.xlu2 %v2160_v14, %s1953_s13 }
  0x8f   : > { %615 = vrot.lane.b32.xlu1 %v2166_v16, %s1953_s13  ;;  %619 = vrot.lane.b32.xlu0 %v2163_v15, %s1953_s13 }
  0x90   : > { %v2243_v28 = vpop.permute.xlu2 %445 }
  0x91   : > { %3909 = vst [vmem:[#allocation19_spill] sm:$0xff] %v2243_v28 }
  0x96   : > { %623 = vrot.lane.b32.xlu2 %v2175_v17, %s1953_s13 }
  0x97   : > { %621 = vrot.lane.b32.xlu1 %v2181_v19, %s1953_s13  ;;  %625 = vrot.lane.b32.xlu0 %v2178_v18, %s1953_s13 }
  0x98   : > { %v2251_v29 = vpop.permute.xlu2 %474 }
  0x99   : > { %3910 = vst [vmem:[#allocation20_spill] sm:$0xff] %v2251_v29 }
  0x9e   : > { %629 = vrot.lane.b32.xlu2 %v2190_v20, %s1953_s13 }
  0x9f   : > { %627 = vrot.lane.b32.xlu1 %v2196_v22, %s1953_s13  ;;  %631 = vrot.lane.b32.xlu0 %v2193_v21, %s1953_s13 }
  0xa0   : > { %v2261_v31 = vpop.permute.xlu2 %480 }
  0xa1   : > { %v2259_v30 = vpop.permute.xlu1 %430  ;;  %3911 = vst [vmem:[#allocation21_spill] sm:$0xff] %v2261_v31  ;;  %v2263_v32 = vpop.permute.xlu0 %420  ;;  %v506_v31 = vlaneseq }
  0xa2   : > { %3912 = vst [vmem:[#allocation22_spill] sm:$0xff] %v2263_v32 }
  0xa6   : > { %635 = vrot.lane.b32.xlu2 %v2205_v23, %s1953_s13 }
  0xa7   : > { %633 = vrot.lane.b32.xlu1 %v2211_v25, %s1953_s13  ;;  %637 = vrot.lane.b32.xlu0 %v2208_v24, %s1953_s13 }
  0xa8   : > { %v2273_v34 = vpop.permute.xlu2 %486 }
  0xa9   : > { %v2271_v33 = vpop.permute.xlu1 %435  ;;  %3914 = vst [vmem:[#allocation24_spill] sm:$0xff] %v2273_v34  ;;  %v2275_v35 = vpop.permute.xlu0 %425 }
  0xaa   : > { %3913 = vst [vmem:[#allocation23_spill] sm:$0xff] %v2271_v33 }
  0xae   : > { %679 = vperm.xlu2 %1770, %v2122_v6  }
  0xaf   : > { %675 = vperm.xlu1 %1769, %v2104_v3   ;;  %683 = vperm.xlu0 %1771, %v2099_v2  }
  0xb0   : > { %v2282_v37 = vpop.permute.xlu2 %492 }
  0xb1   : > { %v2280_v36 = vpop.permute.xlu1 %455  ;;  %v2284_v38 = vpop.permute.xlu0 %450 }
  0xb2   : > { %3915 = vst [vmem:[#allocation25_spill] sm:$0xff] %v2280_v36 }
  0xb3   : > { %3916 = vst [vmem:[#allocation26_spill] sm:$0xff] %v2284_v38 }
  0xb6   : > { %691 = vperm.xlu2 %1770, %v2094_v1  }
  0xb7   : > { %687 = vperm.xlu1 %1769, %v2117_v5   ;;  %703 = vperm.xlu0 %1771, %v2130_v7  }
  0xb8   : > { %v2291_v40 = vpop.permute.xlu2 %498 }
  0xb9   : > { %v2289_v39 = vpop.permute.xlu1 %478  ;;  %v2293_v41 = vpop.permute.xlu0 %476 }
  0xbe   : > { %699 = vperm.xlu2 %1770, %v2138_v9  }
  0xbf   : > { %695 = vperm.xlu1 %1769, %v2112_v4   ;;  %742 = vrot.lane.b32.xlu0 %v2145_v10, %s1955_s20 }
  0xc0   : > { %v2301_v43 = vpop.permute.xlu2 %504  ;;  %1773 = vset.pattern.permute.xlu0 %v1956_v45 }
  0xc1   : > { %v2299_v42 = vpop.permute.xlu1 %484  ;;  %v2303_v44 = vpop.permute.xlu0 %482 }
  0xc2   : > { %3917 = vst [vmem:[#allocation27_spill] sm:$0xff] %v2299_v42 }
  0xc6   : > { %740 = vrot.lane.b32.xlu2 %v2151_v12, %s1955_s20 }
  0xc7   : > { %738 = vrot.lane.b32.xlu1 %v2133_v8, %s1955_s20  ;;  %748 = vrot.lane.b32.xlu0 %v2160_v14, %s1955_s20 }
  0xc8   : > { %1772 = vset.pattern.permute.xlu2 %v1956_v45  ;;  %v2313_v47 = vpop.permute.xlu2 %552  ;;  %1774 = vset.pattern.permute.xlu1 %v1956_v45  ;;  %v1958_v45 = vmov 3  }
  0xc9   : > { %v2311_v46 = vpop.permute.xlu1 %490  ;;  %v2315_v48 = vpop.permute.xlu0 %488 }
  0xca   : > { %3918 = vst [vmem:[#allocation28_spill] sm:$0xff] %v2311_v46 }
  0xce   : > { %746 = vrot.lane.b32.xlu2 %v2166_v16, %s1955_s20 }
  0xcf   : > { %744 = vrot.lane.b32.xlu1 %v2148_v11, %s1955_s20  ;;  %754 = vrot.lane.b32.xlu0 %v2175_v17, %s1955_s20 }
  0xd0   : > { %v2325_v50 = vpop.permute.xlu2 %560 }
  0xd1   : > { %v2323_v49 = vpop.permute.xlu1 %496  ;;  %v2327_v51 = vpop.permute.xlu0 %494 }
  0xd2   : > { %3919 = vst [vmem:[#allocation29_spill] sm:$0xff] %v2323_v49 }
  0xd6   : > { %752 = vrot.lane.b32.xlu2 %v2181_v19, %s1955_s20 }
  0xd7   : > { %750 = vrot.lane.b32.xlu1 %v2163_v15, %s1955_s20  ;;  %760 = vrot.lane.b32.xlu0 %v2190_v20, %s1955_s20 }
  0xd8   : > { %v2337_v53 = vpop.permute.xlu2 %572 }
  0xd9   : > { %v2335_v52 = vpop.permute.xlu1 %502  ;;  %3921 = vst [vmem:[#allocation31_spill] sm:$0xff] %v2337_v53  ;;  %v2339_v54 = vpop.permute.xlu0 %500 }
  0xda   : > { %3920 = vst [vmem:[#allocation30_spill] sm:$0xff] %v2335_v52 }
  0xdb   : > { %3922 = vst [vmem:[#allocation32_spill] sm:$0xff] %v2339_v54 }
  0xde   : > { %758 = vrot.lane.b32.xlu2 %v2196_v22, %s1955_s20 }
  0xdf   : > { %756 = vrot.lane.b32.xlu1 %v2178_v18, %s1955_s20  ;;  %766 = vrot.lane.b32.xlu0 %v2205_v23, %s1955_s20 }
  0xe0   : > { %v2349_v56 = vpop.permute.xlu2 %611 }
  0xe1   : > { %v2347_v55 = vpop.permute.xlu1 %548  ;;  %v2351_v57 = vpop.permute.xlu0 %544 }
  0xe2   : > { %3923 = vst [vmem:[#allocation33_spill] sm:$0xff] %v2351_v57  ;;  %v2436_v57 = vand.u32 127, %v506_v31 }
  0xe4   : > { %vm639_vm0 = vcmp.lt.s32.totalorder %v2436_v57, 16  ;;  %vm770_vm1 = vcmp.lt.s32.totalorder %v2436_v57, 15  ;;  %vm508_vm2 = vcmp.lt.s32.totalorder %v2436_v57, 17  ;;  %vm901_vm3 = vcmp.lt.s32.totalorder %v2436_v57, 1 }
  0xe5   : > { %vm1032_vm4 = vcmp.lt.s32.totalorder %v2436_v57, 127  ;;  %vm1163_vm6 = vcmp.lt.s32.totalorder %v2436_v57, 113  ;;  %vm1294_vm7 = vcmp.lt.s32.totalorder %v2436_v57, 112  ;;  %vm1425_vm8 = vcmp.lt.s32.totalorder %v2436_v57, 111 }
  0xe6   : > { %764 = vrot.lane.b32.xlu2 %v2211_v25, %s1955_s20 }
  0xe7   : > { %762 = vrot.lane.b32.xlu1 %v2193_v21, %s1955_s20  ;;  %810 = vperm.xlu0 %1773, %v2122_v6  }
  0xe8   : > { %v2360_v59 = vpop.permute.xlu2 %617 }
  0xe9   : > { %v2358_v58 = vpop.permute.xlu1 %556  ;;  %3925 = vst [vmem:[#allocation35_spill] sm:$0xff] %v2360_v59  ;;  %v2362_v60 = vpop.permute.xlu0 %564 }
  0xea   : > { %3924 = vst [vmem:[#allocation34_spill] sm:$0xff] %v2358_v58 }
  0xeb   : > { %3926 = vst [vmem:[#allocation36_spill] sm:$0xff] %v2362_v60 }
  0xee   : > { %806 = vperm.xlu2 %1772, %v2104_v3  }
  0xef   : > { %768 = vrot.lane.b32.xlu1 %v2208_v24, %s1955_s20  ;;  %830 = vperm.xlu0 %1773, %v2138_v9  }
  0xf0   : > { %v2370_v62 = vpop.permute.xlu2 %623 }
  0xf1   : > { %v2368_v61 = vpop.permute.xlu1 %568  ;;  %3928 = vst [vmem:[#allocation38_spill] sm:$0xff] %v2370_v62  ;;  %v2372_v63 = vpop.permute.xlu0 %607 }
  0xf2   : > { %3927 = vst [vmem:[#allocation37_spill] sm:$0xff] %v2368_v61 }
  0xf3   : > { %3929 = vst [vmem:[#allocation39_spill] sm:$0xff] %v2372_v63 }
  0xf6   : > { %818 = vperm.xlu2 %1772, %v2117_v5  }
  0xf7   : > { %814 = vperm.xlu1 %1774, %v2099_v2   ;;  %871 = vrot.lane.b32.xlu0 %v2151_v12, %s1957_s22 }
  0xf8   : > { %v2380_v13 = vpop.permute.xlu2 %629  ;;  %1775 = vset.pattern.permute.xlu0 %v1958_v45 }
  0xf9   : > { %v2378_v0 = vpop.permute.xlu1 %609  ;;  %3930 = vst [vmem:[#allocation40_spill] sm:$0xff] %v2380_v13  ;;  %v2382_v27 = vpop.permute.xlu0 %613 }
  0xfa   : > { %3931 = vst [vmem:[#allocation41_spill] sm:$0xff] %v2382_v27 }
  0xfe   : > { %826 = vperm.xlu2 %1772, %v2112_v4  }
  0xff   : > { %822 = vperm.xlu1 %1774, %v2094_v1   ;;  %877 = vrot.lane.b32.xlu0 %v2166_v16, %s1957_s22 }
 0x100   : > { %v2390_v61 = vpop.permute.xlu2 %635 }
 0x101   : > { %v2388_v38 = vpop.permute.xlu1 %615  ;;  %3932 = vst [vmem:[#allocation42_spill] sm:$0xff] %v2390_v61  ;;  %v2392_v34 = vpop.permute.xlu0 %619 }
 0x102   : > { %3933 = vst [vmem:[#allocation43_spill] sm:$0xff] %v2392_v34 }
 0x106   : > { %869 = vrot.lane.b32.xlu2 %v2133_v8, %s1957_s22 }
 0x107   : > { %834 = vperm.xlu1 %1774, %v2130_v7   ;;  %883 = vrot.lane.b32.xlu0 %v2181_v19, %s1957_s22 }
 0x108   : > { %1777 = vset.pattern.permute.xlu2 %v1958_v45  ;;  %v2399_v58 = vpop.permute.xlu2 %679 }
 0x109   : > { %v622_v52 = vpop.permute.xlu1 %621  ;;  %v2401_v33 = vpop.permute.xlu0 %625 }
 0x10e   : > { %875 = vrot.lane.b32.xlu2 %v2148_v11, %s1957_s22 }
 0x10f   : > { %873 = vrot.lane.b32.xlu1 %v2145_v10, %s1957_s22  ;;  %889 = vrot.lane.b32.xlu0 %v2196_v22, %s1957_s22 }
 0x110   : > { %1776 = vset.pattern.permute.xlu1 %v1958_v45  ;;  %v2411_v61 = vpop.permute.xlu2 %691 }
 0x111   : > { %v2409_v34 = vpop.permute.xlu1 %627  ;;  %3934 = vst [vmem:[#allocation44_spill] sm:$0xff] %v2411_v61  ;;  %v2413_v27 = vpop.permute.xlu0 %631 }
 0x116   : > { %881 = vrot.lane.b32.xlu2 %v2163_v15, %s1957_s22 }
 0x117   : > { %879 = vrot.lane.b32.xlu1 %v2160_v14, %s1957_s22  ;;  %895 = vrot.lane.b32.xlu0 %v2211_v25, %s1957_s22 }
 0x118   : > { %v2423_v49 = vpop.permute.xlu2 %699 }
 0x119   : > { %v2421_v13 = vpop.permute.xlu1 %633  ;;  %3936 = vst [vmem:[#allocation46_spill] sm:$0xff] %v2423_v49  ;;  %v638_v45 = vpop.permute.xlu0 %637  ;;  %v2442_v49 = vld [vmem:[%s3834_s3] sm:$0xff] }
 0x11a   : > { %3935 = vst [vmem:[#allocation45_spill] sm:$0xff] %v2421_v13  ;;  %v2447_v13 = vld [vmem:[%s3834_s3 + $0x8] sm:$0xff]  ;;  %v655_v63 = vsel %vm639_vm0, %v638_v45, %v622_v52  ;;  %v2454_v31 = vperm.slane %v2442_v49, 1 }
 0x11b   : > { %3938 = vst [vmem:[#allocation48_spill] sm:$0xff] %v2442_v49  ;;  %v2457_v62 = vperm.slane %v2447_v13, 1 }
 0x11c   : > { %3939 = vst [vmem:[#allocation49_spill] sm:$0xff] %v2447_v13  ;;  %v672_v42 = vmul.f32 %v2454_v31, %v655_v63 }
 0x11e   : > { %887 = vrot.lane.b32.xlu2 %v2178_v18, %s1957_s22 }
 0x11f   : > { %885 = vrot.lane.b32.xlu1 %v2175_v17, %s1957_s22  ;;  %937 = vperm.xlu0 %1775, %v2104_v3  }
 0x120   : > { %v2432_v59 = vpop.permute.xlu2 %740 }
 0x121   : > { %v2430_v60 = vpop.permute.xlu1 %675  ;;  %v2434_v32 = vpop.permute.xlu0 %683 }
 0x122   : > { %3937 = vst [vmem:[#allocation47_spill] sm:$0xff] %v2430_v60  ;;  %v647_v60 = vsel %vm639_vm0, %v622_v52, %v638_v45 }
 0x123   : > { %v673_v54 = vmul.f32 %v2457_v62, %v647_v60 }
 0x126   : > { %893 = vrot.lane.b32.xlu2 %v2193_v21, %s1957_s22 }
 0x127   : > { %891 = vrot.lane.b32.xlu1 %v2190_v20, %s1957_s22  ;;  %957 = vperm.xlu0 %1775, %v2112_v4   ;;  %v1960_v4 = vmov 5  }
 0x128   : > { %v2468_v52 = vpop.permute.xlu2 %746 }
 0x129   : > { %v2466_v28 = vpop.permute.xlu1 %687  ;;  %v704_v45 = vpop.permute.xlu0 %703 }
 0x12a   : > { %3940 = vst [vmem:[#allocation50_spill] sm:$0xff] %v2466_v28  ;;  %v2470_v29 = vmul.f32 %v704_v45, %v672_v42  ;;  %v2472_v46 = vmul.f32 %v704_v45, %v673_v54 }
 0x12c   : > { %3941 = vst [vmem:[#allocation51_spill] sm:$0xff] %v2470_v29 }
 0x12d   : > { %3942 = vst [vmem:[#allocation52_spill] sm:$0xff] %v2472_v46 }
 0x12e   : > { %899 = vrot.lane.b32.xlu2 %v2208_v24, %s1957_s22 }
 0x12f   : > { %897 = vrot.lane.b32.xlu1 %v2205_v23, %s1957_s22  ;;  %1000 = vrot.lane.b32.xlu0 %v2133_v8, %s1959_s5 }
 0x130   : > { %v2482_v63 = vpop.permute.xlu2 %752  ;;  %1780 = vset.pattern.permute.xlu0 %v1960_v4 }
 0x131   : > { %v2480_v60 = vpop.permute.xlu1 %695  ;;  %v743_v28 = vpop.permute.xlu0 %742 }
 0x132   : > { %3943 = vst [vmem:[#allocation53_spill] sm:$0xff] %v2480_v60 }
 0x136   : > { %945 = vperm.xlu2 %1777, %v2099_v2  }
 0x137   : > { %941 = vperm.xlu1 %1776, %v2122_v6   ;;  %1006 = vrot.lane.b32.xlu0 %v2148_v11, %s1959_s5 }
 0x138   : > { %v759_v54 = vpop.permute.xlu2 %758 }
 0x139   : > { %v739_v42 = vpop.permute.xlu1 %738  ;;  %v749_v45 = vpop.permute.xlu0 %748  ;;  %v2491_v8 = vsel %vm770_vm1, %v743_v28, %v759_v54  ;;  %v2495_v60 = vsel %vm770_vm1, %v759_v54, %v743_v28  ;;  %v2506_v28 = vperm.slane %v2442_v49, 2  ;;  %v2509_v54 = vperm.slane %v2447_v13, 2 }
 0x13e   : > { %953 = vperm.xlu2 %1777, %v2094_v1  }
 0x13f   : > { %949 = vperm.xlu1 %1776, %v2117_v5   ;;  %1012 = vrot.lane.b32.xlu0 %v2163_v15, %s1959_s5 }
 0x140   : > { %v765_v46 = vpop.permute.xlu2 %764 }
 0x141   : > { %v745_v11 = vpop.permute.xlu1 %744  ;;  %v755_v29 = vpop.permute.xlu0 %754  ;;  %v776_v6 = vsel %vm770_vm1, %v749_v45, %v765_v46  ;;  %v784_v3 = vsel %vm770_vm1, %v765_v46, %v749_v45 }
 0x142   : > { %v771_v1 = vsel %vm770_vm1, %v739_v42, %v755_v29  ;;  %v779_v15 = vsel %vm770_vm1, %v755_v29, %v739_v42 }
 0x143   : > { %v789_v5 = vmul.f32 %v2506_v28, %v779_v15  ;;  %v790_v46 = vmul.f32 %v2509_v54, %v771_v1  ;;  %v2531_v1 = vperm.slane %v2442_v49, 0  ;;  %v2534_v15 = vperm.slane %v2447_v13, 0 }
 0x146   : > { %965 = vperm.xlu2 %1777, %v2130_v7  }
 0x147   : > { %961 = vperm.xlu1 %1776, %v2138_v9   ;;  %1018 = vrot.lane.b32.xlu0 %v2178_v18, %s1959_s5 }
 0x148   : > { %v807_v36 = vpop.permute.xlu2 %806 }
 0x149   : > { %v751_v45 = vpop.permute.xlu1 %750  ;;  %v761_v53 = vpop.permute.xlu0 %760  ;;  %v2521_v23 = vmul.f32 %v807_v36, %v789_v5  ;;  %v2523_v25 = vmul.f32 %v807_v36, %v790_v46  ;;  %v510_v5 = vsel %vm508_vm2, %v2293_v41, %v2282_v37  ;;  %v518_v36 = vsel %vm508_vm2, %v2282_v37, %v2293_v41 }
 0x14a   : > { %v774_v29 = vsel %vm770_vm1, %v745_v11, %v761_v53  ;;  %v782_v42 = vsel %vm770_vm1, %v761_v53, %v745_v11  ;;  %v641_v11 = vsel %vm639_vm0, %v2378_v0, %v2401_v33  ;;  %v649_v53 = vsel %vm639_vm0, %v2401_v33, %v2378_v0 }
 0x14b   : > { %3944 = vst [vmem:[#allocation54_spill] sm:$0xff] %v2521_v23  ;;  %v795_v46 = vmul.f32 %v2506_v28, %v782_v42  ;;  %v796_v37 = vmul.f32 %v2509_v54, %v774_v29  ;;  %v529_v23 = vmul.f32 %v2531_v1, %v518_v36  ;;  %v530_v13 = vmul.f32 %v2534_v15, %v510_v5 }
 0x14c   : > { %3945 = vst [vmem:[#allocation55_spill] sm:$0xff] %v2523_v25  ;;  %v660_v33 = vmul.f32 %v2454_v31, %v649_v53  ;;  %v661_v0 = vmul.f32 %v2457_v62, %v641_v11 }
 0x14d   : > { %v577_v5 = vmul.f32 %v2347_v55, %v529_v23  ;;  %v578_v36 = vmul.f32 %v2347_v55, %v530_v13 }
 0x14e   : > { %1004 = vrot.lane.b32.xlu2 %v2145_v10, %s1959_s5  ;;  %v709_v23 = vmul.f32 %v2399_v58, %v661_v0 }
 0x14f   : > { %1002 = vrot.lane.b32.xlu1 %v2151_v12, %s1959_s5  ;;  %1024 = vrot.lane.b32.xlu0 %v2193_v21, %s1959_s5 }
 0x150   : > { %1778 = vset.pattern.permute.xlu1 %v1960_v4  ;;  %v819_v25 = vpop.permute.xlu2 %818  ;;  %1779 = vset.pattern.permute.xlu2 %v1960_v4  ;;  %v460_v4 = vmul.f32 %v2275_v35, %v2151_v12 }
 0x151   : > { %v757_v41 = vpop.permute.xlu1 %756  ;;  %v767_v49 = vpop.permute.xlu0 %766  ;;  %v2562_v9 = vmul.f32 %v819_v25, %v795_v46  ;;  %v2564_v61 = vmul.f32 %v819_v25, %v796_v37  ;;  %v799_v25 = vmul.f32 %v2506_v28, %v784_v3  ;;  %v800_v46 = vmul.f32 %v2509_v54, %v776_v6 }
 0x152   : > { %v777_v29 = vsel %vm770_vm1, %v751_v45, %v767_v49  ;;  %v785_v42 = vsel %vm770_vm1, %v767_v49, %v751_v45  ;;  %v772_v11 = vsel %vm770_vm1, %v2432_v59, %v757_v41  ;;  %v780_v53 = vsel %vm770_vm1, %v757_v41, %v2432_v59 }
 0x153   : > { %3946 = vst [vmem:[#allocation56_spill] sm:$0xff] %v2564_v61  ;;  %v461_v49 = vmul.f32 %v2275_v35, %v2178_v18  ;;  %v708_v45 = vmul.f32 %v2399_v58, %v660_v33  ;;  %v593_v3 = vadd.f32 %v577_v5, %v460_v4  ;;  %v791_v55 = vmul.f32 %v2506_v28, %v780_v53 }
 0x154   : > { %v792_v59 = vmul.f32 %v2509_v54, %v772_v11  ;;  %v511_v53 = vsel %vm508_vm2, %v2289_v39, %v2327_v51 }
 0x155   : > { %v594_v6 = vadd.f32 %v578_v36, %v461_v49  ;;  %v724_v4 = vadd.f32 %v708_v45, %v593_v3  ;;  %v532_v45 = vmul.f32 %v2534_v15, %v511_v53  ;;  %v802_v3 = vmul.f32 %v2509_v54, %v777_v29 }
 0x156   : > { %1010 = vrot.lane.b32.xlu2 %v2160_v14, %s1959_s5 }
 0x157   : > { %1008 = vrot.lane.b32.xlu1 %v2166_v16, %s1959_s5  ;;  %1030 = vrot.lane.b32.xlu0 %v2208_v24, %s1959_s5  ;;  %v725_v5 = vadd.f32 %v709_v23, %v594_v6  ;;  %v801_v23 = vmul.f32 %v2506_v28, %v785_v42 }
 0x158   : > { %v827_v13 = vpop.permute.xlu2 %826 }
 0x159   : > { %v763_v35 = vpop.permute.xlu1 %762  ;;  %v811_v41 = vpop.permute.xlu0 %810  ;;  %v2606_v33 = vmul.f32 %v827_v13, %v799_v25  ;;  %v2608_v0 = vmul.f32 %v827_v13, %v800_v46 }
 0x15a   : > { %v2599_v58 = vsel %vm770_vm1, %v2468_v52, %v763_v35  ;;  %v2604_v37 = vsel %vm770_vm1, %v763_v35, %v2468_v52  ;;  %v839_v36 = vmul.f32 %v811_v41, %v791_v55  ;;  %v840_v11 = vmul.f32 %v811_v41, %v792_v59 }
 0x15b   : > { %v519_v52 = vsel %vm508_vm2, %v2327_v51, %v2289_v39  ;;  %v642_v39 = vsel %vm639_vm0, %v2349_v56, %v2409_v34  ;;  %v650_v51 = vsel %vm639_vm0, %v2409_v34, %v2349_v56  ;;  %v513_v34 = vsel %vm508_vm2, %v2303_v44, %v2291_v40 }
 0x15c   : > { %v2618_v49 = vadd.f32 %v839_v36, %v724_v4  ;;  %v2620_v25 = vadd.f32 %v840_v11, %v725_v5  ;;  %v531_v46 = vmul.f32 %v2531_v1, %v519_v52  ;;  %v521_v56 = vsel %vm508_vm2, %v2291_v40, %v2303_v44 }
 0x15d   : > { %v662_v41 = vmul.f32 %v2454_v31, %v650_v51  ;;  %v663_v4 = vmul.f32 %v2457_v62, %v642_v39  ;;  %v462_v5 = vmul.f32 %v2259_v30, %v2145_v10  ;;  %v463_v36 = vmul.f32 %v2259_v30, %v2196_v22 }
 0x15e   : > { %1016 = vrot.lane.b32.xlu2 %v2175_v17, %s1959_s5  ;;  %v579_v13 = vmul.f32 %v2313_v47, %v531_v46  ;;  %v644_v40 = vsel %vm639_vm0, %v2388_v38, %v2413_v27  ;;  %v652_v44 = vsel %vm639_vm0, %v2413_v27, %v2388_v38  ;;  %v535_v53 = vmul.f32 %v2531_v1, %v521_v56 }
 0x15f   : > { %1014 = vrot.lane.b32.xlu1 %v2181_v19, %s1959_s5  ;;  %1076 = vperm.xlu0 %1780, %v2099_v2   ;;  %v711_v11 = vmul.f32 %v2434_v32, %v663_v4  ;;  %v536_v52 = vmul.f32 %v2534_v15, %v513_v34  ;;  %v794_v38 = vmul.f32 %v2509_v54, %v2491_v8 }
 0x160   : > { %v2639_v55 = vpop.permute.xlu2 %869  ;;  %v595_v30 = vadd.f32 %v579_v13, %v462_v5  ;;  %v667_v27 = vmul.f32 %v2457_v62, %v644_v40  ;;  %v583_v8 = vmul.f32 %v2325_v50, %v535_v53  ;;  %v467_v4 = vmul.f32 %v2235_v26, %v2193_v21  ;;  %v3949_v5 = vld [vmem:[#allocation44_spill] sm:$0xff] }
 0x161   : > { %v769_v6 = vpop.permute.xlu1 %768  ;;  %v831_v35 = vpop.permute.xlu0 %830  ;;  %v584_v56 = vmul.f32 %v2325_v50, %v536_v52  ;;  %v3950_v50 = vld [vmem:[#allocation18_spill] sm:$0xff]  ;;  %v797_v53 = vmul.f32 %v2506_v28, %v2604_v37  ;;  %v798_v21 = vmul.f32 %v2509_v54, %v2599_v58  ;;  %v3953_v58 = vld [vmem:[#allocation25_spill] sm:$0xff] }
 0x162   : > { %v2644_v2 = vsel %vm770_vm1, %v2482_v63, %v769_v6  ;;  %v2649_v59 = vsel %vm770_vm1, %v769_v6, %v2482_v63  ;;  %v2659_v29 = vmul.f32 %v831_v35, %v801_v23  ;;  %v2661_v42 = vmul.f32 %v831_v35, %v802_v3 }
 0x163   : > { %v580_v63 = vmul.f32 %v2313_v47, %v532_v45  ;;  %v710_v47 = vmul.f32 %v2434_v32, %v662_v41  ;;  %v793_v45 = vmul.f32 %v2506_v28, %v2495_v60  ;;  %v666_v32 = vmul.f32 %v2454_v31, %v652_v44  ;;  %v3951_v44 = vld [vmem:[#allocation17_spill] sm:$0xff] }
 0x164   : > { %3947 = vst [vmem:[#allocation57_spill] sm:$0xff] %v2659_v29  ;;  %v516_v60 = vsel %vm508_vm2, %v2315_v48, %v2301_v43  ;;  %v466_v41 = vmul.f32 %v2235_v26, %v2166_v16  ;;  %v715_v40 = vmul.f32 %v3949_v5, %v667_v27  ;;  %v3952_v27 = vld [vmem:[#allocation31_spill] sm:$0xff] }
 0x165   : > { %3948 = vst [vmem:[#allocation58_spill] sm:$0xff] %v2661_v42  ;;  %v596_v46 = vadd.f32 %v580_v63, %v463_v36  ;;  %v726_v23 = vadd.f32 %v710_v47, %v595_v30  ;;  %v714_v36 = vmul.f32 %v3949_v5, %v666_v32 }
 0x166   : > { %1022 = vrot.lane.b32.xlu2 %v2190_v20, %s1959_s5  ;;  %v599_v47 = vadd.f32 %v583_v8, %v466_v41  ;;  %v3955_v8 = vld [vmem:[#allocation12_spill] sm:$0xff]  ;;  %v804_v41 = vmul.f32 %v2509_v54, %v2644_v2  ;;  %v1962_v2 = vmov 6  }
 0x167   : > { %1020 = vrot.lane.b32.xlu1 %v2196_v22, %s1959_s5  ;;  %1096 = vperm.xlu0 %1780, %v2130_v7   ;;  %v727_v3 = vadd.f32 %v711_v11, %v596_v46  ;;  %v524_v7 = vsel %vm508_vm2, %v2301_v43, %v2315_v48  ;;  %v542_v48 = vmul.f32 %v2534_v15, %v516_v60 }
 0x168   : > { %v2694_v51 = vpop.permute.xlu2 %875  ;;  %v541_v43 = vmul.f32 %v2531_v1, %v524_v7  ;;  %v600_v11 = vadd.f32 %v584_v56, %v467_v4  ;;  %v730_v30 = vadd.f32 %v714_v36, %v599_v47  ;;  %v3954_v7 = vld [vmem:[#allocation9_spill] sm:$0xff]  ;;  %v803_v56 = vmul.f32 %v2506_v28, %v2649_v59  ;;  %v3956_v4 = vld [vmem:[#allocation51_spill] sm:$0xff]  ;;  %v3957_v36 = vld [vmem:[#allocation52_spill] sm:$0xff] }
 0x169   : > { %v815_v39 = vpop.permute.xlu1 %814  ;;  %v872_v34 = vpop.permute.xlu0 %871 }
 0x16a   : > { %v841_v6 = vmul.f32 %v815_v39, %v793_v45  ;;  %v842_v35 = vmul.f32 %v815_v39, %v794_v38  ;;  %v731_v46 = vadd.f32 %v715_v40, %v600_v11  ;;  %v589_v39 = vmul.f32 %v3952_v27, %v541_v43 }
 0x16c   : > { %v2706_v13 = vadd.f32 %v841_v6, %v726_v23  ;;  %v2708_v63 = vadd.f32 %v842_v35, %v727_v3  ;;  %v590_v23 = vmul.f32 %v3952_v27, %v542_v48  ;;  %v472_v6 = vmul.f32 %v3953_v58, %v2181_v19 }
 0x16e   : > { %1028 = vrot.lane.b32.xlu2 %v3951_v44, %s1959_s5  ;;  %v605_v35 = vadd.f32 %v589_v39, %v472_v6 }
 0x16f   : > { %1026 = vrot.lane.b32.xlu1 %v3950_v50, %s1959_s5  ;;  %1135 = vrot.lane.b32.xlu0 %v2145_v10, %s1961_s29  ;;  %v473_v10 = vmul.f32 %v3953_v58, %v2208_v24  ;;  %v3961_v58 = vld [vmem:[#allocation20_spill] sm:$0xff]  ;;  %s1557_s5 = scalar_lea.sflag [#allocation4], %s2079_s7 }
 0x170   : > { %v2728_v52 = vpop.permute.xlu2 %881  ;;  %v736_v5 = vadd.f32 %v3956_v4, %v605_v35  ;;  %1782 = vset.pattern.permute.xlu0 %v1962_v2  ;;  %v3962_v35 = vld [vmem:[#allocation10_spill] sm:$0xff]  ;;  %v3965_v4 = vld [vmem:[#allocation32_spill] sm:$0xff] }
 0x171   : > { %v823_v26 = vpop.permute.xlu1 %822  ;;  %v878_v32 = vpop.permute.xlu0 %877  ;;  %v606_v60 = vadd.f32 %v590_v23, %v473_v10  ;;  %v3960_v23 = vld [vmem:[#allocation28_spill] sm:$0xff] }
 0x172   : > { %v845_v45 = vmul.f32 %v823_v26, %v797_v53  ;;  %v846_v38 = vmul.f32 %v823_v26, %v798_v21  ;;  %v3958_v21 = vld [vmem:[#allocation11_spill] sm:$0xff]  ;;  %v3959_v26 = vld [vmem:[#allocation8_spill] sm:$0xff]  ;;  %v509_v6 = vsel %vm508_vm2, %v3961_v58, %v3960_v23  ;;  %v517_v10 = vsel %vm508_vm2, %v3960_v23, %v3961_v58 }
 0x173   : > { %v737_v40 = vadd.f32 %v3957_v36, %v606_v60  ;;  %v3964_v60 = vld [vmem:[#allocation19_spill] sm:$0xff] }
 0x174   : > { %v2732_v37 = vadd.f32 %v845_v45, %v730_v30  ;;  %v2734_v3 = vadd.f32 %v846_v38, %v731_v46 }
 0x176   : > { %1072 = vperm.xlu2 %1779, %v3955_v8  }
 0x177   : > { %1068 = vperm.xlu1 %1778, %v3954_v7   ;;  %1141 = vrot.lane.b32.xlu0 %v2160_v14, %s1961_s29  ;;  %v468_v7 = vmul.f32 %v3964_v60, %v2160_v14 }
 0x178   : > { %v888_v43 = vpop.permute.xlu2 %887 }
 0x179   : > { %v835_v24 = vpop.permute.xlu1 %834  ;;  %v884_v11 = vpop.permute.xlu0 %883  ;;  %v2753_v28 = vsel %vm901_vm3, %v872_v34, %v888_v43  ;;  %v2757_v54 = vsel %vm901_vm3, %v888_v43, %v872_v34  ;;  %v3967_v43 = vld [vmem:[#allocation38_spill] sm:$0xff] }
 0x17a   : > { %v851_v48 = vmul.f32 %v835_v24, %v803_v56  ;;  %v852_v47 = vmul.f32 %v835_v24, %v804_v41  ;;  %v527_v56 = vmul.f32 %v2531_v1, %v517_v10  ;;  %v528_v41 = vmul.f32 %v2534_v15, %v509_v6 }
 0x17b   : > { %v469_v10 = vmul.f32 %v3964_v60, %v3950_v50 }
 0x17c   : > { %v2759_v59 = vadd.f32 %v851_v48, %v736_v5  ;;  %v2761_v53 = vadd.f32 %v852_v47, %v737_v40  ;;  %v3966_v5 = vld [vmem:[#allocation27_spill] sm:$0xff] }
 0x17d   : > { %v514_v36 = vsel %vm508_vm2, %v3966_v5, %v3965_v4  ;;  %v3968_v48 = vld [vmem:[#allocation39_spill] sm:$0xff] }
 0x17e   : > { %1084 = vperm.xlu2 %1779, %v3959_v26   ;;  %v640_v47 = vsel %vm639_vm0, %v3968_v48, %v3967_v43  ;;  %v648_v14 = vsel %vm639_vm0, %v3967_v43, %v3968_v48  ;;  %v3971_v43 = vld [vmem:[#allocation49_spill] sm:$0xff]  ;;  %v538_v60 = vmul.f32 %v2534_v15, %v514_v36 }
 0x17f   : > { %1080 = vperm.xlu1 %1778, %v3958_v21   ;;  %1147 = vrot.lane.b32.xlu0 %v2175_v17, %s1961_s29  ;;  %v2831_v48 = vperm.slane %v3971_v43, 3  ;;  %v658_v29 = vmul.f32 %v2454_v31, %v648_v14 }
 0x180   : > { %v894_v46 = vpop.permute.xlu2 %893 }
 0x181   : > { %v874_v30 = vpop.permute.xlu1 %873  ;;  %v890_v45 = vpop.permute.xlu0 %889  ;;  %v2769_v34 = vsel %vm901_vm3, %v878_v32, %v894_v46  ;;  %v2773_v38 = vsel %vm901_vm3, %v894_v46, %v878_v32  ;;  %v3963_v32 = vld [vmem:[#allocation14_spill] sm:$0xff]  ;;  %v522_v46 = vsel %vm508_vm2, %v3965_v4, %v3966_v5  ;;  %v3972_v4 = vld [vmem:[#allocation13_spill] sm:$0xff] }
 0x182   : > { %v904_v27 = vsel %vm901_vm3, %v874_v30, %v890_v45  ;;  %v912_v39 = vsel %vm901_vm3, %v890_v45, %v874_v30  ;;  %v3969_v45 = vld [vmem:[#allocation33_spill] sm:$0xff]  ;;  %v3973_v5 = vld [vmem:[#allocation22_spill] sm:$0xff]  ;;  %v537_v50 = vmul.f32 %v2531_v1, %v522_v46 }
 0x183   : > { %v575_v23 = vmul.f32 %v3969_v45, %v527_v56  ;;  %v458_v56 = vmul.f32 %v3973_v5, %v3972_v4  ;;  %v459_v42 = vmul.f32 %v3973_v5, %v2175_v17  ;;  %v3976_v17 = vld [vmem:[#allocation47_spill] sm:$0xff]  ;;  %v925_v46 = vmul.f32 %v2831_v48, %v904_v27 }
 0x184   : > { %v706_v5 = vmul.f32 %v3976_v17, %v658_v29 }
 0x186   : > { %1092 = vperm.xlu2 %1779, %v3963_v32  }
 0x187   : > { %1088 = vperm.xlu1 %1778, %v3962_v35   ;;  %1153 = vrot.lane.b32.xlu0 %v2190_v20, %s1961_s29  ;;  %v576_v35 = vmul.f32 %v3969_v45, %v528_v41  ;;  %v3974_v41 = vld [vmem:[#allocation45_spill] sm:$0xff] }
 0x188   : > { %v900_v24 = vpop.permute.xlu2 %899 }
 0x189   : > { %v880_v40 = vpop.permute.xlu1 %879  ;;  %v896_v21 = vpop.permute.xlu0 %895  ;;  %v2809_v26 = vsel %vm901_vm3, %v884_v11, %v900_v24  ;;  %v2813_v30 = vsel %vm901_vm3, %v900_v24, %v884_v11  ;;  %v3970_v11 = vld [vmem:[#allocation48_spill] sm:$0xff]  ;;  %v592_v36 = vadd.f32 %v576_v35, %v459_v42 }
 0x18a   : > { %v907_v58 = vsel %vm901_vm3, %v880_v40, %v896_v21  ;;  %v915_v6 = vsel %vm901_vm3, %v896_v21, %v880_v40  ;;  %v2828_v24 = vperm.slane %v3970_v11, 3  ;;  %v659_v40 = vmul.f32 %v2457_v62, %v640_v47  ;;  %v3975_v21 = vld [vmem:[#allocation35_spill] sm:$0xff] }
 0x18b   : > { %v645_v45 = vsel %vm639_vm0, %v3975_v21, %v3974_v41  ;;  %v653_v43 = vsel %vm639_vm0, %v3974_v41, %v3975_v21  ;;  %v591_v11 = vadd.f32 %v575_v23, %v458_v56  ;;  %v3977_v23 = vld [vmem:[#allocation36_spill] sm:$0xff] }
 0x18c   : > { %v707_v14 = vmul.f32 %v3976_v17, %v659_v40  ;;  %v924_v47 = vmul.f32 %v2828_v24, %v912_v39  ;;  %v585_v56 = vmul.f32 %v3977_v23, %v537_v50  ;;  %v586_v29 = vmul.f32 %v3977_v23, %v538_v60 }
 0x18d   : > { %v668_v40 = vmul.f32 %v2454_v31, %v653_v43  ;;  %v722_v35 = vadd.f32 %v706_v5, %v591_v11 }
 0x18e   : > { %1133 = vrot.lane.b32.xlu2 %v2151_v12, %s1961_s29  ;;  %v723_v50 = vadd.f32 %v707_v14, %v592_v36  ;;  %v601_v14 = vadd.f32 %v585_v56, %v468_v7  ;;  %v928_v36 = vmul.f32 %v2828_v24, %v2773_v38  ;;  %v930_v38 = vmul.f32 %v2828_v24, %v915_v6 }
 0x18f   : > { %1131 = vrot.lane.b32.xlu1 %v3972_v4, %s1961_s29  ;;  %1159 = vrot.lane.b32.xlu0 %v3951_v44, %s1961_s29  ;;  %v669_v4 = vmul.f32 %v2457_v62, %v645_v45  ;;  %v3978_v45 = vld [vmem:[#allocation53_spill] sm:$0xff] }
 0x190   : > { %1781 = vset.pattern.permute.xlu2 %v1962_v2  ;;  %v946_v21 = vpop.permute.xlu2 %945  ;;  %1783 = vset.pattern.permute.xlu1 %v1962_v2  ;;  %v716_v17 = vmul.f32 %v3978_v45, %v668_v40  ;;  %v929_v40 = vmul.f32 %v2831_v48, %v2769_v34 }
 0x191   : > { %v886_v41 = vpop.permute.xlu1 %885  ;;  %v938_v44 = vpop.permute.xlu0 %937  ;;  %v972_v27 = vmul.f32 %v946_v21, %v924_v47  ;;  %v973_v39 = vmul.f32 %v946_v21, %v925_v46  ;;  %v717_v2 = vmul.f32 %v3978_v45, %v669_v4  ;;  %v3980_v47 = vld [vmem:[#allocation55_spill] sm:$0xff]  ;;  %v602_v4 = vadd.f32 %v586_v29, %v469_v10 }
 0x192   : > { %v902_v12 = vsel %vm901_vm3, %v2639_v55, %v886_v41  ;;  %v910_v42 = vsel %vm901_vm3, %v886_v41, %v2639_v55  ;;  %v3979_v55 = vld [vmem:[#allocation54_spill] sm:$0xff]  ;;  %v854_v46 = vadd.f32 %v3980_v47, %v723_v50  ;;  %v732_v7 = vadd.f32 %v716_v17, %v601_v14  ;;  %v3986_v14 = vld [vmem:[#allocation41_spill] sm:$0xff] }
 0x193   : > { %v920_v43 = vmul.f32 %v2828_v24, %v910_v42  ;;  %v921_v60 = vmul.f32 %v2831_v48, %v902_v12  ;;  %v2874_v23 = vadd.f32 %v972_v27, %v2706_v13  ;;  %v2877_v61 = vadd.f32 %v973_v39, %v2708_v63  ;;  %v3981_v63 = vld [vmem:[#allocation15_spill] sm:$0xff] }
 0x194   : > { %v853_v41 = vadd.f32 %v3979_v55, %v722_v35  ;;  %v733_v56 = vadd.f32 %v717_v2, %v602_v4  ;;  %v931_v12 = vmul.f32 %v2831_v48, %v907_v58  ;;  %v863_v27 = vadd.f32 %v2606_v33, %v732_v7  ;;  %v3984_v55 = vld [vmem:[#allocation29_spill] sm:$0xff]  ;;  %v2972_v4 = vld [vmem:[%s2085_s14 + $0x10] sm:$0xff]  ;;  %v3987_v7 = vld [vmem:[#allocation23_spill] sm:$0xff] }
 0x195   : > { %v968_v11 = vmul.f32 %v938_v44, %v920_v43  ;;  %v969_v5 = vmul.f32 %v938_v44, %v921_v60  ;;  %v935_v33 = vmul.f32 %v2831_v48, %v2809_v26 }
 0x196   : > { %1139 = vrot.lane.b32.xlu2 %v2166_v16, %s1961_s29  ;;  %v864_v6 = vadd.f32 %v2608_v0, %v733_v56  ;;  %v3982_v0 = vld [vmem:[#allocation16_spill] sm:$0xff]  ;;  %v3988_v56 = vld [vmem:[#allocation34_spill] sm:$0xff] }
 0x197   : > { %v2885_v21 = vadd.f32 %v968_v11, %v853_v41  ;;  %v2887_v13 = vadd.f32 %v969_v5, %v854_v46  ;;  %1137 = vrot.lane.b32.xlu1 %v3981_v63, %s1961_s29  ;;  %1203 = vperm.xlu0 %1782, %v3955_v8   ;;  %v3985_v5 = vld [vmem:[#allocation40_spill] sm:$0xff]  ;;  %v2977_v63 = vld [vmem:[%s2085_s14 + $0x30] sm:$0xff] }
 0x198   : > { %v954_v10 = vpop.permute.xlu2 %953 }
 0x199   : > { %v892_v34 = vpop.permute.xlu1 %891  ;;  %v958_v16 = vpop.permute.xlu0 %957  ;;  %v976_v8 = vmul.f32 %v954_v10, %v928_v36  ;;  %v977_v44 = vmul.f32 %v954_v10, %v929_v40  ;;  %v643_v36 = vsel %vm639_vm0, %v3986_v14, %v3985_v5  ;;  %v651_v40 = vsel %vm639_vm0, %v3985_v5, %v3986_v14  ;;  %v3020_v14 = vld [vmem:[%s2085_s14 + $0x48] sm:$0xff] }
 0x19a   : > { %v2899_v29 = vsel %vm901_vm3, %v2694_v51, %v892_v34  ;;  %v2904_v42 = vsel %vm901_vm3, %v892_v34, %v2694_v51  ;;  %v978_v58 = vmul.f32 %v958_v16, %v930_v38  ;;  %v979_v39 = vmul.f32 %v958_v16, %v931_v12 }
 0x19b   : > { %v2909_v35 = vadd.f32 %v976_v8, %v2732_v37  ;;  %v2912_v50 = vadd.f32 %v977_v44, %v2734_v3  ;;  %v934_v51 = vmul.f32 %v2828_v24, %v2813_v30  ;;  %v664_v34 = vmul.f32 %v2454_v31, %v651_v40 }
 0x19c   : > { %v2914_v43 = vadd.f32 %v978_v58, %v863_v27  ;;  %v2916_v60 = vadd.f32 %v979_v39, %v864_v6  ;;  %v665_v10 = vmul.f32 %v2457_v62, %v643_v36  ;;  %v3989_v27 = vld [vmem:[#allocation30_spill] sm:$0xff]  ;;  %v3990_v6 = vld [vmem:[#allocation24_spill] sm:$0xff]  ;;  %v3995_v36 = vld [vmem:[#allocation37_spill] sm:$0xff] }
 0x19d   : > { %v523_v58 = vsel %vm508_vm2, %v3989_v27, %v3990_v6  ;;  %v3991_v39 = vld [vmem:[#allocation42_spill] sm:$0xff] }
 0x19e   : > { %1145 = vrot.lane.b32.xlu2 %v2181_v19, %s1961_s29  ;;  %v3983_v19 = vld [vmem:[#allocation21_spill] sm:$0xff] }
 0x19f   : > { %1143 = vrot.lane.b32.xlu1 %v3982_v0, %s1961_s29  ;;  %1223 = vperm.xlu0 %1782, %v3963_v32   ;;  %v520_v32 = vsel %vm508_vm2, %v3984_v55, %v3983_v19  ;;  %v512_v41 = vsel %vm508_vm2, %v3983_v19, %v3984_v55  ;;  %v539_v55 = vmul.f32 %v2531_v1, %v523_v58 }
 0x1a0   : > { %v966_v3 = vpop.permute.xlu2 %965  ;;  %v533_v46 = vmul.f32 %v2531_v1, %v520_v32  ;;  %v534_v11 = vmul.f32 %v2534_v15, %v512_v41 }
 0x1a1   : > { %v898_v37 = vpop.permute.xlu1 %897  ;;  %v2937_v26 = vpop.permute.xlu0 %1000  ;;  %v982_v17 = vmul.f32 %v966_v3, %v934_v51  ;;  %v983_v2 = vmul.f32 %v966_v3, %v935_v33  ;;  %v3992_v51 = vld [vmem:[#allocation43_spill] sm:$0xff]  ;;  %v587_v40 = vmul.f32 %v3995_v36, %v539_v55  ;;  %v3078_v55 = vld [vmem:[%s2085_s14 + $0x70] sm:$0xff] }
 0x1a2   : > { %v2930_v45 = vsel %vm901_vm3, %v2728_v52, %v898_v37  ;;  %v2935_v30 = vsel %vm901_vm3, %v898_v37, %v2728_v52  ;;  %v581_v38 = vmul.f32 %v3988_v56, %v533_v46  ;;  %v646_v33 = vsel %vm639_vm0, %v3992_v51, %v3991_v39  ;;  %v3993_v37 = vld [vmem:[#allocation50_spill] sm:$0xff]  ;;  %4000 = vst [vmem:[#allocation17_spill] sm:$0xff] %v3078_v55 }
 0x1a3   : > { %v2948_v47 = vadd.f32 %v982_v17, %v2759_v59  ;;  %v2951_v52 = vadd.f32 %v983_v2, %v2761_v53  ;;  %v922_v59 = vmul.f32 %v2828_v24, %v2757_v54  ;;  %v923_v53 = vmul.f32 %v2831_v48, %v2753_v28 }
 0x1a4   : > { %v582_v54 = vmul.f32 %v3988_v56, %v534_v11  ;;  %v654_v0 = vsel %vm639_vm0, %v3991_v39, %v3992_v51  ;;  %v712_v3 = vmul.f32 %v3993_v37, %v664_v34  ;;  %v713_v17 = vmul.f32 %v3993_v37, %v665_v10  ;;  %v3052_v10 = vld [vmem:[%s2085_s14 + $0x68] sm:$0xff]  ;;  %v3070_v37 = vld [vmem:[%s3833_s2] sm:$0xff] }
 0x1a5   : > { %v670_v11 = vmul.f32 %v2454_v31, %v654_v0  ;;  %v671_v5 = vmul.f32 %v2457_v62, %v646_v33  ;;  %v927_v62 = vmul.f32 %v2831_v48, %v2899_v29  ;;  %v3034_v31 = vld [vmem:[%s2085_s14 + $0x40] sm:$0xff]  ;;  %v3063_v0 = vld [vmem:[%s2085_s14 + $0x78] sm:$0xff]  ;;  %3999 = vst [vmem:[#allocation18_spill] sm:$0xff] %v3070_v37 }
 0x1a6   : > { %1151 = vrot.lane.b32.xlu2 %v2196_v22, %s1961_s29  ;;  %v465_v22 = vmul.f32 %v3987_v7, %v2190_v20  ;;  %v515_v20 = vsel %vm508_vm2, %v3990_v6, %v3989_v27 }
 0x1a7   : > { %1149 = vrot.lane.b32.xlu1 %v2178_v18, %s1961_s29  ;;  %1264 = vrot.lane.b32.xlu0 %v2972_v4, %s1963_s6  ;;  %v464_v18 = vmul.f32 %v2977_v63, %v3987_v7  ;;  %v540_v46 = vmul.f32 %v2534_v15, %v515_v20  ;;  %v926_v15 = vmul.f32 %v2828_v24, %v2904_v42 }
 0x1a8   : > { %v2985_v28 = vpop.permute.xlu2 %1004  ;;  %v598_v41 = vadd.f32 %v582_v54, %v465_v22  ;;  %v3996_v22 = vld [vmem:[#allocation56_spill] sm:$0xff] }
 0x1a9   : > { %v942_v12 = vpop.permute.xlu1 %941  ;;  %v2989_v44 = vpop.permute.xlu0 %1006  ;;  %v597_v32 = vadd.f32 %v581_v38, %v464_v18  ;;  %v3047_v54 = vld [vmem:[%s2085_s14 + $0x60] sm:$0xff] }
 0x1aa   : > { %v970_v16 = vmul.f32 %v942_v12, %v922_v59  ;;  %v971_v8 = vmul.f32 %v942_v12, %v923_v53  ;;  %v588_v59 = vmul.f32 %v3995_v36, %v540_v46  ;;  %v3997_v12 = vld [vmem:[#allocation26_spill] sm:$0xff] }
 0x1ab   : > { %v728_v1 = vadd.f32 %v712_v3, %v597_v32  ;;  %v470_v34 = vmul.f32 %v3047_v54, %v3997_v12  ;;  %v932_v3 = vmul.f32 %v2828_v24, %v2935_v30  ;;  %v4001_v32 = vld [vmem:[#allocation57_spill] sm:$0xff]  ;;  %v4002_v46 = vld [vmem:[#allocation58_spill] sm:$0xff]  ;;  %v3888_v30 = vmov 7  }
 0x1ac   : > { %v3010_v2 = vadd.f32 %v970_v16, %v2618_v49  ;;  %v3013_v19 = vadd.f32 %v971_v8, %v2620_v25  ;;  %v3025_v49 = vld [vmem:[%s2085_s14 + $0x58] sm:$0xff]  ;;  %v729_v25 = vadd.f32 %v713_v17, %v598_v41  ;;  %v471_v16 = vmul.f32 %v3052_v10, %v3997_v12  ;;  %v3998_v8 = vld [vmem:[#allocation46_spill] sm:$0xff]  ;;  %1784 = vset.pattern.permute.xlu0 %v3888_v30 }
 0x1ad   : > { %3994 = vst [vmem:[#allocation44_spill] sm:$0xff] %v3025_v49  ;;  %v859_v18 = vadd.f32 %v2562_v9, %v728_v1  ;;  %v718_v9 = vmul.f32 %v3998_v8, %v670_v11  ;;  %v719_v27 = vmul.f32 %v3998_v8, %v671_v5  ;;  %v603_v58 = vadd.f32 %v587_v40, %v470_v34  ;;  %v3103_v40 = vld [vmem:[%s3833_s2 + $0x10] sm:$0xff]  ;;  %v3134_v34 = vld [vmem:[%s3833_s2 + $0x20] sm:$0xff] }
 0x1ae   : > { %1157 = vrot.lane.b32.xlu2 %v3025_v49, %s1961_s29  ;;  %v860_v56 = vadd.f32 %v3996_v22, %v729_v25  ;;  %v604_v39 = vadd.f32 %v588_v59, %v471_v16  ;;  %v933_v17 = vmul.f32 %v2831_v48, %v2930_v45  ;;  %v3109_v59 = vld [vmem:[%s3833_s2 + $0x18] sm:$0xff]  ;;  %v3140_v16 = vld [vmem:[%s3833_s2 + $0x28] sm:$0xff]  ;;  %v249_v8 = vpack.c.bf16 %v3078_v55, %v3047_v54 }
 0x1af   : > { %1155 = vrot.lane.b32.xlu1 %v3020_v14, %s1961_s29  ;;  %1270 = vrot.lane.b32.xlu0 %v3034_v31, %s1963_s6  ;;  %v734_v51 = vadd.f32 %v718_v9, %v603_v58  ;;  %4004 = vst [vmem:[#allocation25_spill] sm:$0xff] %v3140_v16 }
 0x1b0   : > { %v3040_v7 = vpop.permute.xlu2 %1010  ;;  %v735_v33 = vadd.f32 %v719_v27, %v604_v39  ;;  %1689 = vmatpush.bf16.msra.mxu2 %v249_v8  ;;  %288 = vmatpush.bf16.msra.mxu0 %v249_v8 }
 0x1b1   : > { %v950_v53 = vpop.permute.xlu1 %949  ;;  %v3044_v29 = vpop.permute.xlu0 %1012  ;;  %v865_v41 = vadd.f32 %v4001_v32, %v734_v51 }
 0x1b2   : > { %v974_v42 = vmul.f32 %v950_v53, %v926_v15  ;;  %v975_v38 = vmul.f32 %v950_v53, %v927_v62  ;;  %v866_v11 = vadd.f32 %v4002_v46, %v735_v33 }
 0x1b4   : > { %v3058_v6 = vadd.f32 %v974_v42, %v859_v18  ;;  %v3060_v20 = vadd.f32 %v975_v38, %v860_v56 }
 0x1b6   : > { %1199 = vperm.xlu2 %1781, %v3070_v37  }
 0x1b7   : > { %1161 = vrot.lane.b32.xlu1 %v3063_v0, %s1961_s29  ;;  %1276 = vrot.lane.b32.xlu0 %v3078_v55, %s1963_s6 }
 0x1b8   : > { %v1017_v1 = vpop.permute.xlu2 %1016 }
 0x1b9   : > { %v962_v5 = vpop.permute.xlu1 %961  ;;  %v1019_v24 = vpop.permute.xlu0 %1018  ;;  %v3088_v48 = vsel %vm1032_vm4, %v2937_v26, %v1017_v1  ;;  %v3093_v45 = vsel %vm1032_vm4, %v1017_v1, %v2937_v26  ;;  %v3113_v26 = vld [vmem:[%s2085_s14 + $0x28] sm:$0xff]  ;;  %v248_v1 = vpack.c.bf16 %v3025_v49, %v3020_v14 }
 0x1ba   : > { %v980_v25 = vmul.f32 %v962_v5, %v932_v3  ;;  %v981_v15 = vmul.f32 %v962_v5, %v933_v17  ;;  %4003 = vst [vmem:[#allocation31_spill] sm:$0xff] %v3113_v26  ;;  %v4005_v17 = vld [vmem:[#allocation48_spill] sm:$0xff] }
 0x1bb   : > { %v3164_v32 = vperm.slane %v4005_v17, 5 }
 0x1bc   : > { %v3096_v62 = vadd.f32 %v980_v25, %v865_v41  ;;  %v3098_v36 = vadd.f32 %v981_v15, %v866_v11  ;;  %v4006_v41 = vld [vmem:[#allocation49_spill] sm:$0xff]  ;;  %v3170_v11 = vld [vmem:[%s2085_s14 + $0x50] sm:$0xff]  ;;  %v3183_v25 = vld [vmem:[%s2085_s14] sm:$0xff] }
 0x1bd   : > { %v3167_v46 = vperm.slane %v4006_v41, 5  ;;  %v247_v5 = vpack.c.bf16 %v3170_v11, %v3034_v31  ;;  %v3188_v15 = vld [vmem:[%s2085_s14 + $0x20] sm:$0xff] }
 0x1be   : > { %1211 = vperm.xlu2 %1781, %v3109_v59  }
 0x1bf   : > { %1207 = vperm.xlu1 %1783, %v3103_v40   ;;  %1282 = vrot.lane.b32.xlu0 %v3113_v26, %s1963_s6 }
 0x1c0   : > { %v1023_v18 = vpop.permute.xlu2 %1022  ;;  %1690 = vmatpush.bf16.msra.mxu2 %v247_v5  ;;  %289 = vmatpush.bf16.msra.mxu0 %v247_v5  ;;  %v243_v5 = vpack.c.bf16 %v2972_v4, %v3183_v25 }
 0x1c1   : > { %v1003_v53 = vpop.permute.xlu1 %1002  ;;  %v1025_v42 = vpop.permute.xlu0 %1024  ;;  %v3124_v38 = vsel %vm1032_vm4, %v2989_v44, %v1023_v18  ;;  %v3129_v12 = vsel %vm1032_vm4, %v1023_v18, %v2989_v44  ;;  %v250_v44 = vpack.c.bf16 %v3063_v0, %v3052_v10 }
 0x1c2   : > { %v1034_v22 = vsel %vm1032_vm4, %v1003_v53, %v1019_v24  ;;  %v1042_v56 = vsel %vm1032_vm4, %v1019_v24, %v1003_v53  ;;  %v245_v24 = vpack.c.bf16 %v2977_v63, %v3188_v15  ;;  %v3193_v53 = vld [vmem:[%s2085_s14 + $0x38] sm:$0xff] }
 0x1c3   : > { %1693 = vmatpush.bf16.msra.mxu3 %v250_v44  ;;  %317 = vmatpush.bf16.msra.mxu1 %v250_v44  ;;  %v246_v18 = vpack.c.bf16 %v3193_v53, %v3113_v26  ;;  %v1054_v8 = vmul.f32 %v3167_v46, %v1042_v56 }
 0x1c4   : > { %1691 = vmatpush.bf16.msra.mxu2 %v245_v24  ;;  %290 = vmatpush.bf16.msra.mxu0 %v245_v24 }
 0x1c6   : > { %1219 = vperm.xlu2 %1781, %v3140_v16  }
 0x1c7   : > { %1215 = vperm.xlu1 %1783, %v3134_v34   ;;  %1288 = vrot.lane.b32.xlu0 %v3025_v49, %s1963_s6 }
 0x1c8   : > { %v1029_v27 = vpop.permute.xlu2 %1028  ;;  %1694 = vmatpush.bf16.msra.mxu3 %v248_v1  ;;  %318 = vmatpush.bf16.msra.mxu1 %v248_v1  ;;  %v3214_v1 = vld [vmem:[%s2085_s14 + $0x8] sm:$0xff] }
 0x1c9   : > { %v1009_v9 = vpop.permute.xlu1 %1008  ;;  %v1031_v51 = vpop.permute.xlu0 %1030  ;;  %v3156_v33 = vsel %vm1032_vm4, %v3044_v29, %v1029_v27  ;;  %v3161_v3 = vsel %vm1032_vm4, %v1029_v27, %v3044_v29  ;;  %v3179_v29 = vld [vmem:[%s3833_s2 + $0x38] sm:$0xff]  ;;  %1692 = vmatpush.bf16.msra.mxu2 %v243_v5  ;;  %291 = vmatpush.bf16.msra.mxu0 %v243_v5 }
 0x1ca   : > { %v1037_v58 = vsel %vm1032_vm4, %v1009_v9, %v1025_v42  ;;  %v1045_v39 = vsel %vm1032_vm4, %v1025_v42, %v1009_v9  ;;  %v1053_v42 = vmul.f32 %v3164_v32, %v1034_v22 }
 0x1cc   : > { %1695 = vmatpush.bf16.msra.mxu3 %v246_v18  ;;  %319 = vmatpush.bf16.msra.mxu1 %v246_v18 }
 0x1ce   : > { %1262 = vrot.lane.b32.xlu2 %v3183_v25, %s1963_s6 }
 0x1cf   : > { %1227 = vperm.xlu1 %1783, %v3179_v29   ;;  %1330 = vperm.xlu0 %1784, %v3070_v37   ;;  %v3217_v37 = vld [vmem:[%s2085_s14 + $0x18] sm:$0xff]  ;;  %s1965_s14 = smov 111  }
 0x1d0   : > { %1786 = vset.pattern.permute.xlu2 %v3888_v30  ;;  %v1073_v9 = vpop.permute.xlu2 %1072 }
 0x1d1   : > { %v1015_v44 = vpop.permute.xlu1 %1014  ;;  %v1077_v41 = vpop.permute.xlu0 %1076  ;;  %v1101_v22 = vmul.f32 %v1073_v9, %v1053_v42  ;;  %v1102_v49 = vmul.f32 %v1073_v9, %v1054_v8 }
 0x1d2   : > { %v1040_v27 = vsel %vm1032_vm4, %v1015_v44, %v1031_v51  ;;  %v1048_v17 = vsel %vm1032_vm4, %v1031_v51, %v1015_v44  ;;  %v244_v51 = vpack.c.bf16 %v3217_v37, %v3214_v1  ;;  %v4008_v44 = vmov 7  }
 0x1d3   : > { %v3206_v56 = vadd.f32 %v1101_v22, %v3010_v2  ;;  %v3209_v30 = vadd.f32 %v1102_v49, %v3013_v19  ;;  %v1686_v2 = vld [vmem:[%s3832_s1 + $0x10] sm:$0xff]  ;;  %v1059_v19 = vmul.f32 %v3164_v32, %v1037_v58  ;;  %v1060_v49 = vmul.f32 %v3167_v46, %v1045_v39 }
 0x1d4   : > { %1696 = vmatpush.bf16.msra.mxu3 %v244_v51  ;;  %v1065_v24 = vmul.f32 %v3164_v32, %v1040_v27  ;;  %v1066_v18 = vmul.f32 %v3167_v46, %v1048_v17  ;;  %1672 = vmatmul.msk.bf16.vlgmr.msra.gmra.mxu2 %vm271_vm5, %v1686_v2 }
 0x1d5   : > { %4007 = vst [vmem:[#allocation9_spill] sm:$0xff] %v3209_v30  ;;  %320 = vmatpush.bf16.msra.mxu1 %v244_v51 }
 0x1d6   : > { %1268 = vrot.lane.b32.xlu2 %v2977_v63, %s1963_s6 }
 0x1d7   : > { %1266 = vrot.lane.b32.xlu1 %v3188_v15, %s1963_s6  ;;  %1350 = vperm.xlu0 %1784, %v3140_v16  }
 0x1d8   : > { %v1085_v8 = vpop.permute.xlu2 %1084  ;;  %1785 = vset.pattern.permute.xlu1 %v4008_v44  ;;  %1676 = vmatmul.msk.bf16.vlgmr.msra.gmra.mxu3 %vm271_vm5, %v1686_v2  ;;  %v1064_v2 = vmul.f32 %v3167_v46, %v3161_v3 }
 0x1d9   : > { %v1021_v42 = vpop.permute.xlu1 %1020  ;;  %v1097_v39 = vpop.permute.xlu0 %1096  ;;  %v1107_v22 = vmul.f32 %v1085_v8, %v1059_v19  ;;  %v1108_v16 = vmul.f32 %v1085_v8, %v1060_v49  ;;  %v1063_v49 = vmul.f32 %v3164_v32, %v3156_v33  ;;  %v1684_v8 = vld [vmem:[%s3832_s1] sm:$0xff] }
 0x1da   : > { %v1035_v9 = vsel %vm1032_vm4, %v2985_v28, %v1021_v42  ;;  %v1043_v58 = vsel %vm1032_vm4, %v1021_v42, %v2985_v28  ;;  %v1113_v26 = vmul.f32 %v1097_v39, %v1065_v24  ;;  %v1114_v55 = vmul.f32 %v1097_v39, %v1066_v18  ;;  %1670 = vmatmul.msk.bf16.vlgmr.msra.gmra.mxu0 %vm271_vm5, %v1684_v8 }
 0x1db   : > { %v1055_v27 = vmul.f32 %v3164_v32, %v1035_v9  ;;  %v1056_v17 = vmul.f32 %v3167_v46, %v1043_v58  ;;  %v3245_v44 = vadd.f32 %v1107_v22, %v2909_v35  ;;  %v3248_v30 = vadd.f32 %v1108_v16, %v2912_v50  ;;  %1674 = vmatmul.msk.bf16.vlgmr.msra.gmra.mxu1 %vm271_vm5, %v1684_v8 }
 0x1dc   : > { %v3251_v19 = vadd.f32 %v1113_v26, %v2948_v47  ;;  %v3254_v5 = vadd.f32 %v1114_v55, %v2951_v52 }
 0x1dd   : > { %v1103_v28 = vmul.f32 %v1077_v41, %v1055_v27  ;;  %v1104_v42 = vmul.f32 %v1077_v41, %v1056_v17 }
 0x1de   : > { %1274 = vrot.lane.b32.xlu2 %v3047_v54, %s1963_s6 }
 0x1df   : > { %1272 = vrot.lane.b32.xlu1 %v3170_v11, %s1963_s6  ;;  %v3265_v35 = vadd.f32 %v1103_v28, %v2874_v23  ;;  %1393 = vrot.lane.b32.xlu0 %v3183_v25, %s1965_s14  ;;  %v3270_v50 = vadd.f32 %v1104_v42, %v2877_v61  ;;  %v1687_v61 = vld [vmem:[%s3832_s1 + $0x18] sm:$0xff] }
 0x1e0   : > { %v1093_v52 = vpop.permute.xlu2 %1092 }
 0x1e1   : > { %v1027_v47 = vpop.permute.xlu1 %1026  ;;  %v1111_v16 = vmul.f32 %v1093_v52, %v1063_v49  ;;  %v1112_v23 = vmul.f32 %v1093_v52, %v1064_v2  ;;  %v1136_v33 = vpop.permute.xlu0 %1135 }
 0x1e2   : > { %v1038_v55 = vsel %vm1032_vm4, %v3040_v7, %v1027_v47  ;;  %v1046_v26 = vsel %vm1032_vm4, %v1027_v47, %v3040_v7  ;;  %v1051_v7 = vmul.f32 %v3164_v32, %v3088_v48 }
 0x1e3   : > { %v3279_v3 = vadd.f32 %v1111_v16, %v3096_v62  ;;  %v3282_v25 = vadd.f32 %v1112_v23, %v3098_v36  ;;  %v1052_v62 = vmul.f32 %v3167_v46, %v3093_v45 }
 0x1e4   : > { %1673 = vmatmul.msk.bf16.gmra.mxu2 %vm271_vm5, %v1687_v61 }
 0x1e6   : > { %1280 = vrot.lane.b32.xlu2 %v3217_v37, %s1963_s6 }
 0x1e7   : > { %1278 = vrot.lane.b32.xlu1 %v3214_v1, %s1963_s6  ;;  %1399 = vrot.lane.b32.xlu0 %v2977_v63, %s1965_s14  ;;  %v1057_v63 = vmul.f32 %v3164_v32, %v3124_v38  ;;  %v1062_v38 = vmul.f32 %v3167_v46, %v1046_v26  ;;  %v1966_v26 = vmov 8  }
 0x1e8   : > { %v3297_v41 = vpop.permute.xlu2 %1133  ;;  %1677 = vmatmul.msk.bf16.gmra.mxu3 %vm271_vm5, %v1687_v61  ;;  %1789 = vset.pattern.permute.xlu0 %v1966_v26 }
 0x1e9   : > { %v1069_v36 = vpop.permute.xlu1 %1068  ;;  %v1142_v18 = vpop.permute.xlu0 %1141 }
 0x1ea   : > { %v1099_v51 = vmul.f32 %v1069_v36, %v1051_v7  ;;  %v1100_v24 = vmul.f32 %v1069_v36, %v1052_v62 }
 0x1ec   : > { %v3305_v48 = vadd.f32 %v1099_v51, %v2885_v21  ;;  %v3308_v45 = vadd.f32 %v1100_v24, %v2887_v13  ;;  %v1058_v21 = vmul.f32 %v3167_v46, %v3129_v12  ;;  %v3388_v51 = vld [vmem:[%s3834_s3] sm:$0xff]  ;;  %v3396_v24 = vld [vmem:[%s3834_s3 + $0x8] sm:$0xff] }
 0x1ed   : > { %v3399_v8 = vperm.slane %v3396_v24, 6 }
 0x1ee   : > { %1286 = vrot.lane.b32.xlu2 %v3020_v14, %s1963_s6 }
 0x1ef   : > { %1284 = vrot.lane.b32.xlu1 %v3193_v53, %s1963_s6  ;;  %1405 = vrot.lane.b32.xlu0 %v3047_v54, %s1965_s14  ;;  %v1061_v54 = vmul.f32 %v3164_v32, %v1038_v55  ;;  %v1685_v32 = vld [vmem:[%s3832_s1 + $0x8] sm:$0xff] }
 0x1f0   : > { %v3322_v9 = vpop.permute.xlu2 %1139  ;;  %1671 = vmatmul.msk.bf16.gmra.mxu0 %vm271_vm5, %v1685_v32  ;;  %1675 = vmatmul.msk.bf16.gmra.mxu1 %vm271_vm5, %v1685_v32 }
 0x1f1   : > { %v1081_v13 = vpop.permute.xlu1 %1080  ;;  %v1148_v22 = vpop.permute.xlu0 %1147 }
 0x1f2   : > { %v1105_v58 = vmul.f32 %v1081_v13, %v1057_v63  ;;  %v1106_v39 = vmul.f32 %v1081_v13, %v1058_v21 }
 0x1f4   : > { %v3325_v27 = vadd.f32 %v1105_v58, %v3058_v6  ;;  %v3328_v17 = vadd.f32 %v1106_v39, %v3060_v20 }
 0x1f6   : > { %1292 = vrot.lane.b32.xlu2 %v3063_v0, %s1963_s6 }
 0x1f7   : > { %1290 = vrot.lane.b32.xlu1 %v3052_v10, %s1963_s6  ;;  %1411 = vrot.lane.b32.xlu0 %v3217_v37, %s1965_s14  ;;  %v3352_v37 = vld [vmem:[%s3833_s2 + $0x8] sm:$0xff]  ;;  %s3715_s6 = scalar_lea.vmem [#allocation5], %s1652_s8  ;;  %s1688_s8 = sshll.u32 %s2014_s19, 7 }
 0x1f8   : > { %v3338_v28 = vpop.permute.xlu2 %1145  ;;  %s1568_s25 = scalar_lea.hbm %s3835_s4, %s1688_s8  ;;  %s1569_s30 = sshll.u32 %s3715_s6, 4  ;;  %s1570_s30 = int_to_ptr.vmem [resolvable:$true] %s1569_s30 }
 0x1f9   : > { %v1089_v12 = vpop.permute.xlu1 %1088  ;;  %v1154_v20 = vpop.permute.xlu0 %1153  ;;  %s1571_s19 = sshll.u32 %s1568_s25, 4  ;;  %s1572_s19 = int_to_ptr.hbm [resolvable:$true] %s1571_s19 }
 0x1fa   : > { %v1109_v6 = vmul.f32 %v1089_v12, %v1061_v54  ;;  %v1110_v42 = vmul.f32 %v1089_v12, %v1062_v38  ;;  %s1894_s29 = sshra.s32 %s1572_s19, 4  ;;  %s1895_s29 = int_to_ptr.hbm [resolvable:$true] %s1894_s29 }
 0x1fb   : > { %s1896_s10 = scalar_lea.hbm %s1895_s29, 128  ;;  %p1901_p0 = scmp.lt.s32.totalorder %s1895_s29, %s3835_s4 }
 0x1fc   : > { %v3341_v49 = vadd.f32 %v1109_v6, %v2914_v43  ;;  %v3344_v2 = vadd.f32 %v1110_v42, %v2916_v60  ;;  %p1897_p6 = scmp.ne.s32.totalorder %s1895_s29, %s1896_s10 }
 0x1fe   : > { %1338 = vperm.xlu2 %1786, %v3103_v40   ;;  %p1898_p9 = pnand %p1897_p6, %p2043_p11 }
 0x1ff   : > { %1334 = vperm.xlu1 %1785, %v3352_v37   ;;  %1417 = vrot.lane.b32.xlu0 %v3020_v14, %s1965_s14 }
 0x200   : > { %v1152_v60 = vpop.permute.xlu2 %1151  ;;  %p1899_p13 = pneg %p1898_p9 }
 0x201   : > { %v1132_v43 = vpop.permute.xlu1 %1131  ;;  %v3367_v52 = vsel %vm1163_vm6, %v1136_v33, %v1152_v60  ;;  %v3371_v55 = vsel %vm1163_vm6, %v1152_v60, %v1136_v33  ;;  %v1160_v14 = vpop.permute.xlu0 %1159 }
 0x202   : > { %v1164_v46 = vsel %vm1163_vm6, %v1132_v43, %v1148_v22  ;;  %v1172_v47 = vsel %vm1163_vm6, %v1148_v22, %v1132_v43 }
 0x203   : > { %v1183_v21 = vmul.f32 %v3399_v8, %v1172_v47 }
 0x206   : > { %1346 = vperm.xlu2 %1786, %v3134_v34  }
 0x207   : > { %1342 = vperm.xlu1 %1785, %v3109_v59   ;;  %1423 = vrot.lane.b32.xlu0 %v3063_v0, %s1965_s14  ;;  %v3391_v0 = vperm.slane %v3388_v51, 6 }
 0x208   : > { %v1158_v23 = vpop.permute.xlu2 %1157 }
 0x209   : > { %v1138_v16 = vpop.permute.xlu1 %1137  ;;  %v1169_v33 = vsel %vm1163_vm6, %v1142_v18, %v1158_v23  ;;  %v1177_v62 = vsel %vm1163_vm6, %v1158_v23, %v1142_v18  ;;  %v1204_v36 = vpop.permute.xlu0 %1203  ;;  %v3404_v18 = vld [vmem:[%s3833_s2 + $0x30] sm:$0xff]  ;;  %v1182_v63 = vmul.f32 %v3391_v0, %v1164_v46 }
 0x20a   : > { %v1167_v61 = vsel %vm1163_vm6, %v1138_v16, %v1154_v20  ;;  %v1175_v7 = vsel %vm1163_vm6, %v1154_v20, %v1138_v16 }
 0x20b   : > { %v1189_v47 = vmul.f32 %v3399_v8, %v1175_v7 }
 0x20e   : > { %1358 = vperm.xlu2 %1786, %v3179_v29  }
 0x20f   : > { %1354 = vperm.xlu1 %1785, %v3404_v18   ;;  %1469 = vperm.xlu0 %1789, %v3103_v40  }
 0x210   : > { %v1200_v58 = vpop.permute.xlu2 %1199 }
 0x211   : > { %v1144_v13 = vpop.permute.xlu1 %1143  ;;  %v1230_v54 = vmul.f32 %v1200_v58, %v1182_v63  ;;  %v1231_v38 = vmul.f32 %v1200_v58, %v1183_v21  ;;  %v1224_v12 = vpop.permute.xlu0 %1223  ;;  %v1192_v21 = vmul.f32 %v3391_v0, %v1169_v33 }
 0x212   : > { %v1170_v39 = vsel %vm1163_vm6, %v1144_v13, %v1160_v14  ;;  %v1178_v22 = vsel %vm1163_vm6, %v1160_v14, %v1144_v13  ;;  %v1193_v13 = vmul.f32 %v3399_v8, %v1177_v62 }
 0x213   : > { %v1194_v6 = vmul.f32 %v3391_v0, %v1170_v39  ;;  %v1195_v42 = vmul.f32 %v3399_v8, %v1178_v22  ;;  %v3418_v20 = vadd.f32 %v1230_v54, %v3305_v48  ;;  %v3421_v40 = vadd.f32 %v1231_v38, %v3308_v45  ;;  %v4010_v54 = vld [vmem:[#allocation17_spill] sm:$0xff] }
 0x214   : > { %v1188_v48 = vmul.f32 %v3391_v0, %v1167_v61 }
 0x215   : > { %v1242_v32 = vmul.f32 %v1224_v12, %v1194_v6  ;;  %v1243_v43 = vmul.f32 %v1224_v12, %v1195_v42  ;;  %v1187_v42 = vmul.f32 %v3399_v8, %v3371_v55 }
 0x216   : > { %1397 = vrot.lane.b32.xlu2 %v3188_v15, %s1965_s14 }
 0x217   : > { %v3424_v60 = vadd.f32 %v1242_v32, %v3279_v3  ;;  %v3427_v46 = vadd.f32 %v1243_v43, %v3282_v25  ;;  %1395 = vrot.lane.b32.xlu1 %v2972_v4, %s1965_s14  ;;  %1489 = vperm.xlu0 %1789, %v3179_v29  }
 0x218   : > { %1787 = vset.pattern.permute.xlu1 %v1966_v26  ;;  %v1212_v14 = vpop.permute.xlu2 %1211  ;;  %1788 = vset.pattern.permute.xlu2 %v1966_v26 }
 0x219   : > { %v1150_v45 = vpop.permute.xlu1 %1149  ;;  %v1236_v25 = vmul.f32 %v1212_v14, %v1188_v48  ;;  %v1237_v15 = vmul.f32 %v1212_v14, %v1189_v47  ;;  %v1265_v16 = vpop.permute.xlu0 %1264 }
 0x21a   : > { %v1165_v3 = vsel %vm1163_vm6, %v3297_v41, %v1150_v45  ;;  %v1173_v4 = vsel %vm1163_vm6, %v1150_v45, %v3297_v41 }
 0x21b   : > { %v1184_v23 = vmul.f32 %v3391_v0, %v1165_v3  ;;  %v1185_v61 = vmul.f32 %v3399_v8, %v1173_v4  ;;  %v3445_v29 = vadd.f32 %v1236_v25, %v3325_v27  ;;  %v3448_v26 = vadd.f32 %v1237_v15, %v3328_v17  ;;  %v4009_v27 = vld [vmem:[#allocation9_spill] sm:$0xff] }
 0x21d   : > { %v1232_v7 = vmul.f32 %v1204_v36, %v1184_v23  ;;  %v1233_v63 = vmul.f32 %v1204_v36, %v1185_v61  ;;  %v4013_v61 = vld [vmem:[#allocation18_spill] sm:$0xff] }
 0x21e   : > { %1403 = vrot.lane.b32.xlu2 %v3170_v11, %s1965_s14 }
 0x21f   : > { %1401 = vrot.lane.b32.xlu1 %v3034_v31, %s1965_s14  ;;  %v3457_v41 = vadd.f32 %v1232_v7, %v3206_v56  ;;  %v3460_v58 = vadd.f32 %v1233_v63, %v4009_v27 }
 0x220   : > { %v1220_v39 = vpop.permute.xlu2 %1219 }
 0x221   : > { %v1156_v17 = vpop.permute.xlu1 %1155  ;;  %v1240_v31 = vmul.f32 %v1220_v39, %v1192_v21  ;;  %v1241_v36 = vmul.f32 %v1220_v39, %v1193_v13  ;;  %v1271_v22 = vpop.permute.xlu0 %1270 }
 0x222   : > { %v1168_v33 = vsel %vm1163_vm6, %v3322_v9, %v1156_v17  ;;  %v1176_v62 = vsel %vm1163_vm6, %v1156_v17, %v3322_v9 }
 0x223   : > { %v3469_v11 = vadd.f32 %v1240_v31, %v3341_v49  ;;  %v3472_v56 = vadd.f32 %v1241_v36, %v3344_v2  ;;  %v4011_v2 = vld [vmem:[#allocation31_spill] sm:$0xff]  ;;  %v1191_v55 = vmul.f32 %v3399_v8, %v1176_v62  ;;  %v4014_v31 = vld [vmem:[#allocation25_spill] sm:$0xff] }
 0x226   : > { %1409 = vrot.lane.b32.xlu2 %v3214_v1, %s1965_s14  ;;  %v1186_v1 = vmul.f32 %v3391_v0, %v3367_v52  ;;  %v1190_v52 = vmul.f32 %v3391_v0, %v1168_v33 }
 0x227   : > { %1407 = vrot.lane.b32.xlu1 %v4010_v54, %s1965_s14 }
 0x228   : > { %v3478_v12 = vpop.permute.xlu2 %1262 }
 0x229   : > { %v1162_v38 = vpop.permute.xlu1 %1161  ;;  %v1277_v6 = vpop.permute.xlu0 %1276 }
 0x22a   : > { %v1171_v9 = vsel %vm1163_vm6, %v3338_v28, %v1162_v38  ;;  %v1179_v49 = vsel %vm1163_vm6, %v1162_v38, %v3338_v28 }
 0x22b   : > { %v1197_v7 = vmul.f32 %v3399_v8, %v1179_v49 }
 0x22e   : > { %1415 = vrot.lane.b32.xlu2 %v3193_v53, %s1965_s14  ;;  %v4012_v53 = vld [vmem:[#allocation44_spill] sm:$0xff] }
 0x22f   : > { %1413 = vrot.lane.b32.xlu1 %v4011_v2, %s1965_s14 }
 0x230   : > { %v3494_v43 = vpop.permute.xlu2 %1268 }
 0x231   : > { %v1208_v32 = vpop.permute.xlu1 %1207  ;;  %v1283_v45 = vpop.permute.xlu0 %1282 }
 0x232   : > { %v1234_v48 = vmul.f32 %v1208_v32, %v1186_v1  ;;  %v1235_v47 = vmul.f32 %v1208_v32, %v1187_v42 }
 0x234   : > { %v3497_v28 = vadd.f32 %v1234_v48, %v3265_v35  ;;  %v3500_v14 = vadd.f32 %v1235_v47, %v3270_v50 }
 0x236   : > { %1421 = vrot.lane.b32.xlu2 %v3052_v10, %s1965_s14  ;;  %v1196_v10 = vmul.f32 %v3391_v0, %v1171_v9 }
 0x237   : > { %1419 = vrot.lane.b32.xlu1 %v4012_v53, %s1965_s14  ;;  %s1900_s14 = scalar_lea.hbm %s3835_s4, 256 }
 0x238   : > { %v3508_v4 = vpop.permute.xlu2 %1274  ;;  %p1902_p1 = scmp.lt.s32.totalorder %s1900_s14, %s1896_s10 }
 0x239   : > { %v1216_v3 = vpop.permute.xlu1 %1215  ;;  %v1289_v35 = vpop.permute.xlu0 %1288 }
 0x23a   : > { %v1238_v25 = vmul.f32 %v1216_v3, %v1190_v52  ;;  %v1239_v15 = vmul.f32 %v1216_v3, %v1191_v55  ;;  %p1903_p3 = por %p1902_p1, %p1901_p0 }
 0x23c   : > { %v3511_v23 = vadd.f32 %v1238_v25, %v3245_v44  ;;  %v3514_v50 = vadd.f32 %v1239_v15, %v3248_v30  ;;  %p1904_p4 = pnand %p1903_p3, %p1899_p13 }
 0x23e   : > { %1465 = vperm.xlu2 %1788, %v3352_v37  }
 0x23f   : > { %1461 = vperm.xlu1 %1787, %v4013_v61  }
 0x240   : > { %v1281_v21 = vpop.permute.xlu2 %1280 }
 0x241   : > { %v1228_v63 = vpop.permute.xlu1 %1227  ;;  %v3523_v44 = vsel %vm1294_vm7, %v1265_v16, %v1281_v21  ;;  %v3527_v30 = vsel %vm1294_vm7, %v1281_v21, %v1265_v16  ;;  %v1331_v17 = vpop.permute.xlu0 %1330 }
 0x242   : > { %v1244_v13 = vmul.f32 %v1228_v63, %v1196_v10  ;;  %v1245_v27 = vmul.f32 %v1228_v63, %v1197_v7 }
 0x244   : > { %v3530_v37 = vadd.f32 %v1244_v13, %v3251_v19  ;;  %v3533_v0 = vadd.f32 %v1245_v27, %v3254_v5 }
 0x246   : > { %1477 = vperm.xlu2 %1788, %v3134_v34   ;;  %v3551_v34 = vperm.slane %v3396_v24, 7 }
 0x247   : > { %1473 = vperm.xlu1 %1787, %v3109_v59   ;;  %v3548_v59 = vperm.slane %v3388_v51, 7 }
 0x248   : > { %v1287_v39 = vpop.permute.xlu2 %1286 }
 0x249   : > { %v1267_v8 = vpop.permute.xlu1 %1266  ;;  %v1299_v62 = vsel %vm1294_vm7, %v1271_v22, %v1287_v39  ;;  %v1307_v19 = vsel %vm1294_vm7, %v1287_v39, %v1271_v22  ;;  %v1351_v5 = vpop.permute.xlu0 %1350 }
 0x24a   : > { %v1297_v33 = vsel %vm1294_vm7, %v1267_v8, %v1283_v45  ;;  %v1305_v16 = vsel %vm1294_vm7, %v1283_v45, %v1267_v8  ;;  %v1321_v63 = vmul.f32 %v3548_v59, %v1299_v62  ;;  %v1322_v21 = vmul.f32 %v3551_v34, %v1307_v19 }
 0x24b   : > { %v1317_v48 = vmul.f32 %v3548_v59, %v1297_v33  ;;  %v1318_v47 = vmul.f32 %v3551_v34, %v1305_v16 }
 0x24e   : > { %1485 = vperm.xlu2 %1788, %v3404_v18  }
 0x24f   : > { %1481 = vperm.xlu1 %1787, %v4014_v31  }
 0x250   : > { %v1293_v54 = vpop.permute.xlu2 %1292 }
 0x251   : > { %v1273_v36 = vpop.permute.xlu1 %1272  ;;  %v1302_v22 = vsel %vm1294_vm7, %v1277_v6, %v1293_v54  ;;  %v1310_v18 = vsel %vm1294_vm7, %v1293_v54, %v1277_v6  ;;  %v3563_v24 = vpop.permute.xlu0 %1393 }
 0x252   : > { %v1300_v38 = vsel %vm1294_vm7, %v1273_v36, %v1289_v35  ;;  %v1308_v9 = vsel %vm1294_vm7, %v1289_v35, %v1273_v36  ;;  %v1327_v39 = vmul.f32 %v3548_v59, %v1302_v22  ;;  %v1328_v33 = vmul.f32 %v3551_v34, %v1310_v18 }
 0x253   : > { %v1323_v51 = vmul.f32 %v3548_v59, %v1300_v38  ;;  %v1324_v49 = vmul.f32 %v3551_v34, %v1308_v9  ;;  %v1316_v38 = vmul.f32 %v3551_v34, %v3527_v30 }
 0x255   : > { %v1371_v2 = vmul.f32 %v1351_v5, %v1323_v51  ;;  %v1372_v1 = vmul.f32 %v1351_v5, %v1324_v49 }
 0x257   : > { %v3566_v42 = vadd.f32 %v1371_v2, %v3469_v11  ;;  %v3569_v32 = vadd.f32 %v1372_v1, %v3472_v56  ;;  %v303_v62 = vpop.f32.mrf.mxu2 }
 0x258   : > { %v1339_v6 = vpop.permute.xlu2 %1338 }
 0x259   : > { %v1279_v45 = vpop.permute.xlu1 %1278  ;;  %v1365_v55 = vmul.f32 %v1339_v6, %v1317_v48  ;;  %v1366_v11 = vmul.f32 %v1339_v6, %v1318_v47  ;;  %v3587_v10 = vpop.permute.xlu0 %1399 }
 0x25a   : > { %v1295_v53 = vsel %vm1294_vm7, %v3478_v12, %v1279_v45  ;;  %v1303_v52 = vsel %vm1294_vm7, %v1279_v45, %v3478_v12 }
 0x25b   : > { %v1313_v3 = vmul.f32 %v3548_v59, %v1295_v53  ;;  %v1314_v56 = vmul.f32 %v3551_v34, %v1303_v52  ;;  %v3582_v25 = vadd.f32 %v1365_v55, %v3497_v28  ;;  %v3585_v15 = vadd.f32 %v1366_v11, %v3500_v14  ;;  %v3641_v53 = vpop.f32.mrf.mxu0  ;;  %v3643_v52 = vpop.f32.mrf.mxu1 }
 0x25d   : > { %v1361_v35 = vmul.f32 %v1331_v17, %v1313_v3  ;;  %v1362_v61 = vmul.f32 %v1331_v17, %v1314_v56 }
 0x25f   : > { %v3590_v7 = vadd.f32 %v1361_v35, %v3418_v20  ;;  %v3593_v12 = vadd.f32 %v1362_v61, %v3421_v40  ;;  %v3627_v2 = vpop.f32.mrf.mxu2 }
 0x260   : > { %v1347_v28 = vpop.permute.xlu2 %1346 }
 0x261   : > { %v1285_v13 = vpop.permute.xlu1 %1284  ;;  %v1369_v17 = vmul.f32 %v1347_v28, %v1321_v63  ;;  %v1370_v20 = vmul.f32 %v1347_v28, %v1322_v21  ;;  %v3611_v16 = vpop.permute.xlu0 %1405 }
 0x262   : > { %v1298_v14 = vsel %vm1294_vm7, %v3494_v43, %v1285_v13  ;;  %v1306_v27 = vsel %vm1294_vm7, %v1285_v13, %v3494_v43  ;;  %v332_v43 = vpop.f32.mrf.mxu3 }
 0x263   : > { %v3604_v8 = vadd.f32 %v1369_v17, %v3511_v23  ;;  %v3607_v40 = vadd.f32 %v1370_v20, %v3514_v50  ;;  %v1315_v50 = vmul.f32 %v3548_v59, %v3523_v44  ;;  %v1319_v44 = vmul.f32 %v3548_v59, %v1298_v14  ;;  %v324_v17 = vpop.f32.mrf.mxu1 }
 0x264   : > { %v1320_v30 = vmul.f32 %v3551_v34, %v1306_v27  ;;  %v295_v27 = vpop.f32.mrf.mxu0 }
 0x265   : > { %v344_v20 = vmul.f32 0.5, %v295_v27 }
 0x267   : > { %v308_v56 = vpop.f32.mrf.mxu2  ;;  %1792 = vtanh.f32 %v344_v20 }
 0x268   : > { %v1359_v5 = vpop.permute.xlu2 %1358 }
 0x269   : > { %v1291_v19 = vpop.permute.xlu1 %1290  ;;  %v1375_v31 = vmul.f32 %v1359_v5, %v1327_v39  ;;  %v1376_v36 = vmul.f32 %v1359_v5, %v1328_v33  ;;  %v3625_v49 = vpop.permute.xlu0 %1411  ;;  %v345_v33 = vmul.f32 0.5, %v324_v17 }
 0x26a   : > { %v3635_v1 = vpop.f32.mrf.mxu3  ;;  %v1301_v11 = vsel %vm1294_vm7, %v3508_v4, %v1291_v19  ;;  %v1309_v3 = vsel %vm1294_vm7, %v1291_v19, %v3508_v4 }
 0x26b   : > { %v3614_v54 = vadd.f32 %v1375_v31, %v3530_v37  ;;  %v3617_v23 = vadd.f32 %v1376_v36, %v3533_v0  ;;  %v1325_v61 = vmul.f32 %v3548_v59, %v1301_v11  ;;  %v350_v36 = vmul.f32 0.5, %v303_v62 }
 0x26c   : > { %1794 = vtanh.f32 %v345_v33 }
 0x26f   : > { %v310_v39 = vpop.f32.mrf.mxu2 }
 0x270   : > { %v3623_v22 = vpop.permute.xlu2 %1397  ;;  %v356_v5 = vmul.f32 0.5, %v310_v39 }
 0x271   : > { %v1335_v9 = vpop.permute.xlu1 %1334  ;;  %v3651_v55 = vpop.permute.xlu0 %1417 }
 0x272   : > { %v1363_v18 = vmul.f32 %v1335_v9, %v1315_v50  ;;  %v1364_v51 = vmul.f32 %v1335_v9, %v1316_v38  ;;  %v337_v35 = vpop.f32.mrf.mxu3  ;;  %1796 = vtanh.f32 %v356_v5  ;;  %v327_v38 = vpop.f32.mrf.mxu1 }
 0x273   : > { %v1793_v9 = vpop.eup %1792 }
 0x274   : > { %v3630_v37 = vadd.f32 %v1363_v18, %v3457_v41  ;;  %v3633_v0 = vadd.f32 %v1364_v51, %v3460_v58 }
 0x278   : > { %v3639_v47 = vpop.permute.xlu2 %1403 }
 0x279   : > { %v1343_v48 = vpop.permute.xlu1 %1342  ;;  %v1424_v4 = vpop.permute.xlu0 %1423 }
 0x27a   : > { %v1367_v45 = vmul.f32 %v1343_v48, %v1319_v44  ;;  %v1368_v6 = vmul.f32 %v1343_v48, %v1320_v30  ;;  %v339_v59 = vpop.f32.mrf.mxu3  ;;  %v1795_v44 = vpop.eup %1794  ;;  %v347_v48 = vmul.f32 0.5, %v327_v38 }
 0x27b   : > { %v357_v31 = vmul.f32 0.5, %v339_v59  ;;  %v1797_v62 = vpop.eup %1796 }
 0x27c   : > { %v3646_v41 = vadd.f32 %v1367_v45, %v3445_v29  ;;  %v3649_v58 = vadd.f32 %v1368_v6, %v3448_v26  ;;  %v1326_v29 = vmul.f32 %v3551_v34, %v1309_v3  ;;  %v3684_v45 = vld [vmem:[%s3834_s3 + $0x18] ss:$0 sm:$0xff]  ;;  %v354_v6 = vmul.f32 0.5, %v308_v56 }
 0x27d   : > { %1798 = vtanh.f32 %v357_v31  ;;  %v388_v20 = vadd.f32 1.0, %v1797_v62 }
 0x27e   : > { %1800 = vtanh.f32 %v350_v36 }
 0x280   : > { %v3661_v21 = vpop.permute.xlu2 %1409 }
 0x281   : > { %v1355_v63 = vpop.permute.xlu1 %1354  ;;  %v3671_v50 = vpop.permute.xlu0 %1469 }
 0x282   : > { %v1373_v26 = vmul.f32 %v1355_v63, %v1325_v61  ;;  %v1374_v13 = vmul.f32 %v1355_v63, %v1326_v29  ;;  %v376_v29 = vadd.f32 1.0, %v1793_v9  ;;  %v377_v63 = vadd.f32 1.0, %v1795_v44 }
 0x283   : > { %v1799_v11 = vpop.eup %1798 }
 0x284   : > { %v3664_v28 = vadd.f32 %v1373_v26, %v3424_v60  ;;  %v3667_v14 = vadd.f32 %v1374_v13, %v3427_v46  ;;  %v351_v60 = vmul.f32 0.5, %v332_v43  ;;  %v298_v46 = vpop.f32.mrf.mxu0  ;;  %v3679_v43 = vld [vmem:[%s3834_s3 + $0x10] ss:$0 sm:$0xff]  ;;  %v1801_v26 = vpop.eup %1800  ;;  %v355_v13 = vmul.f32 0.5, %v337_v35 }
 0x285   : > { %v346_v30 = vmul.f32 0.5, %v298_v46  ;;  %v389_v39 = vadd.f32 1.0, %v1799_v11  ;;  %v382_v33 = vadd.f32 1.0, %v1801_v26  ;;  %v392_v59 = vmul.f32 0.5, %v376_v29 }
 0x286   : > { %1802 = vtanh.f32 %v351_v60  ;;  %v393_v5 = vmul.f32 0.5, %v377_v63 }
 0x287   : > { %1804 = vtanh.f32 %v346_v30  ;;  %v405_v62 = vmul.f32 0.5, %v389_v39 }
 0x288   : > { %v3669_v34 = vpop.permute.xlu2 %1415  ;;  %1806 = vtanh.f32 %v347_v48  ;;  %v404_v48 = vmul.f32 0.5, %v388_v20 }
 0x289   : > { %v1396_v19 = vpop.permute.xlu1 %1395  ;;  %1808 = vtanh.f32 %v354_v6  ;;  %v1490_v46 = vpop.permute.xlu0 %1489 }
 0x28a   : > { %v1427_v3 = vsel %vm1425_vm8, %v1396_v19, %v3625_v49  ;;  %v1435_v61 = vsel %vm1425_vm8, %v3625_v49, %v1396_v19  ;;  %1810 = vtanh.f32 %v355_v13 }
 0x28b   : > { %v1446_v17 = vmul.f32 %v3679_v43, %v1427_v3  ;;  %v1447_v56 = vmul.f32 %v3684_v45, %v1435_v61 }
 0x28c   : > { %v1803_v27 = vpop.eup %1802 }
 0x28d   : > { %v383_v38 = vadd.f32 1.0, %v1803_v27  ;;  %v1805_v30 = vpop.eup %1804 }
 0x28e   : > { %v1807_v3 = vpop.eup %1806 }
 0x28f   : > { %v1809_v27 = vpop.eup %1808 }
 0x290   : > { %v3673_v51 = vpop.permute.xlu2 %1421  ;;  %v1811_v39 = vpop.eup %1810 }
 0x291   : > { %v1402_v18 = vpop.permute.xlu1 %1401 }
 0x292   : > { %v1438_v61 = vsel %vm1425_vm8, %v3651_v55, %v1402_v18 }
 0x293   : > { %v1453_v20 = vmul.f32 %v3684_v45, %v1438_v61 }
 0x298   : > { %v1466_v36 = vpop.permute.xlu2 %1465 }
 0x299   : > { %v1408_v31 = vpop.permute.xlu1 %1407  ;;  %v1494_v19 = vmul.f32 %v1466_v36, %v1446_v17  ;;  %v1495_v60 = vmul.f32 %v1466_v36, %v1447_v56  ;;  %v342_v17 = vmul.f32 0.5, %v3641_v53  ;;  %v399_v53 = vmul.f32 0.5, %v383_v38 }
 0x29a   : > { %v1433_v49 = vsel %vm1425_vm8, %v1408_v31, %v1424_v4  ;;  %v1441_v35 = vsel %vm1425_vm8, %v1424_v4, %v1408_v31  ;;  %v1430_v4 = vsel %vm1425_vm8, %v1402_v18, %v3651_v55  ;;  %v378_v55 = vadd.f32 1.0, %v1805_v30 }
 0x29b   : > { %v1458_v9 = vmul.f32 %v3679_v43, %v1433_v49  ;;  %v1459_v44 = vmul.f32 %v3684_v45, %v1441_v35  ;;  %v1510_v6 = vadd.f32 %v1494_v19, %v3630_v37  ;;  %v1511_v11 = vadd.f32 %v1495_v60, %v3633_v0 }
 0x29c   : > { %v1452_v56 = vmul.f32 %v3679_v43, %v1430_v4  ;;  %v379_v18 = vadd.f32 1.0, %v1807_v3  ;;  %1812 = vtanh.f32 %v342_v17  ;;  %v394_v38 = vmul.f32 0.5, %v378_v55  ;;  %v329_v4 = vpop.f32.mrf.mxu1 }
 0x29d   : > { %v1506_v29 = vmul.f32 %v1490_v46, %v1458_v9  ;;  %v1507_v63 = vmul.f32 %v1490_v46, %v1459_v44  ;;  %v1526_v26 = vmul.f32 %v1510_v6, %v392_v59  ;;  %v1527_v13 = vmul.f32 %v1511_v11, %v393_v5  ;;  %v300_v6 = vpop.f32.mrf.mxu0 }
 0x29e   : > { %v398_v59 = vmul.f32 0.5, %v382_v33  ;;  %v343_v33 = vmul.f32 0.5, %v3643_v52  ;;  %v395_v9 = vmul.f32 0.5, %v379_v18  ;;  %v1440_v52 = vsel %vm1425_vm8, %v3673_v51, %v3611_v16 }
 0x29f   : > { %v1522_v37 = vadd.f32 %v1506_v29, %v3614_v54  ;;  %v1523_v0 = vadd.f32 %v1507_v63, %v3617_v23  ;;  %1542 = vst [vmem:[%s3715_s6 + $0x10] sm:$0xff] %v1526_v26  ;;  %v386_v11 = vadd.f32 1.0, %v1809_v27 }
 0x2a0   : > { %1543 = vst [vmem:[%s3715_s6 + $0x18] sm:$0xff] %v1527_v13  ;;  %v1478_v31 = vpop.permute.xlu2 %1477  ;;  %1814 = vtanh.f32 %v343_v33 }
 0x2a1   : > { %v1538_v54 = vmul.f32 %v1522_v37, %v404_v48  ;;  %v1539_v23 = vmul.f32 %v1523_v0, %v405_v62  ;;  %v1414_v5 = vpop.permute.xlu1 %1413  ;;  %v1500_v35 = vmul.f32 %v1478_v31, %v1452_v56  ;;  %v1501_v19 = vmul.f32 %v1478_v31, %v1453_v20 }
 0x2a2   : > { %v1428_v36 = vsel %vm1425_vm8, %v3623_v22, %v1414_v5  ;;  %v1436_v49 = vsel %vm1425_vm8, %v1414_v5, %v3623_v22  ;;  %v1432_v22 = vsel %vm1425_vm8, %v3611_v16, %v3673_v51  ;;  %v1457_v51 = vmul.f32 %v3684_v45, %v1440_v52  ;;  %v1813_v63 = vpop.eup %1812 }
 0x2a3   : > { %1554 = vst [vmem:[%s3715_s6 + $0x70] sm:$0xff] %v1538_v54  ;;  %v1448_v60 = vmul.f32 %v3679_v43, %v1428_v36  ;;  %v1449_v46 = vmul.f32 %v3684_v45, %v1436_v49  ;;  %v1516_v44 = vadd.f32 %v1500_v35, %v3604_v8  ;;  %v1517_v30 = vadd.f32 %v1501_v19, %v3607_v40 }
 0x2a4   : > { %1555 = vst [vmem:[%s3715_s6 + $0x78] sm:$0xff] %v1539_v23  ;;  %v387_v8 = vadd.f32 1.0, %v1811_v39  ;;  %v1456_v16 = vmul.f32 %v3679_v43, %v1432_v22  ;;  %v349_v37 = vmul.f32 0.5, %v329_v4  ;;  %v402_v0 = vmul.f32 0.5, %v386_v11 }
 0x2a5   : > { %v1496_v48 = vmul.f32 %v3671_v50, %v1448_v60  ;;  %v1497_v62 = vmul.f32 %v3671_v50, %v1449_v46  ;;  %v1532_v3 = vmul.f32 %v1516_v44, %v398_v59  ;;  %v1533_v40 = vmul.f32 %v1517_v30, %v399_v53 }
 0x2a6   : > { %v348_v50 = vmul.f32 0.5, %v300_v6  ;;  %v403_v56 = vmul.f32 0.5, %v387_v8  ;;  %v1815_v18 = vpop.eup %1814  ;;  %v1426_v39 = vsel %vm1425_vm8, %v3563_v24, %v3661_v21  ;;  %v1434_v59 = vsel %vm1425_vm8, %v3661_v21, %v3563_v24 }
 0x2a7   : > { %v1512_v61 = vadd.f32 %v1496_v48, %v3582_v25  ;;  %v1513_v29 = vadd.f32 %v1497_v62, %v3585_v15  ;;  %1548 = vst [vmem:[%s3715_s6 + $0x40] sm:$0xff] %v1532_v3  ;;  %v1444_v23 = vmul.f32 %v3679_v43, %v1426_v39  ;;  %v375_v5 = vadd.f32 1.0, %v1815_v18 }
 0x2a8   : > { %1549 = vst [vmem:[%s3715_s6 + $0x48] sm:$0xff] %v1533_v40  ;;  %v1486_v17 = vpop.permute.xlu2 %1485  ;;  %1816 = vtanh.f32 %v348_v50  ;;  %v352_v31 = vmul.f32 0.5, %v3627_v2  ;;  %v353_v24 = vmul.f32 0.5, %v3635_v1  ;;  %v1429_v2 = vsel %vm1425_vm8, %v3587_v10, %v3669_v34 }
 0x2a9   : > { %v1528_v26 = vmul.f32 %v1512_v61, %v394_v38  ;;  %v1529_v13 = vmul.f32 %v1513_v29, %v395_v9  ;;  %v1420_v27 = vpop.permute.xlu1 %1419  ;;  %v1504_v25 = vmul.f32 %v1486_v17, %v1456_v16  ;;  %v1505_v20 = vmul.f32 %v1486_v17, %v1457_v51 }
 0x2aa   : > { %1818 = vtanh.f32 %v349_v37  ;;  %v391_v60 = vmul.f32 0.5, %v375_v5  ;;  %v1437_v9 = vsel %vm1425_vm8, %v3669_v34, %v3587_v10  ;;  %v1431_v40 = vsel %vm1425_vm8, %v3639_v47, %v1420_v27 }
 0x2ab   : > { %1544 = vst [vmem:[%s3715_s6 + $0x20] sm:$0xff] %v1528_v26  ;;  %v1520_v15 = vadd.f32 %v1504_v25, %v3664_v28  ;;  %v1521_v55 = vadd.f32 %v1505_v20, %v3667_v14  ;;  %v1445_v28 = vmul.f32 %v3684_v45, %v1434_v59  ;;  %v374_v14 = vadd.f32 1.0, %v1813_v63 }
 0x2ac   : > { %1545 = vst [vmem:[%s3715_s6 + $0x28] sm:$0xff] %v1529_v13  ;;  %1820 = vtanh.f32 %v352_v31  ;;  %v1439_v4 = vsel %vm1425_vm8, %v1420_v27, %v3639_v47 }
 0x2ad   : > { %v1536_v53 = vmul.f32 %v1520_v15, %v402_v0  ;;  %v1537_v54 = vmul.f32 %v1521_v55, %v403_v56  ;;  %v390_v21 = vmul.f32 0.5, %v374_v14  ;;  %1822 = vtanh.f32 %v353_v24 }
 0x2ae   : > { %v1817_v49 = vpop.eup %1816 }
 0x2af   : > { %1552 = vst [vmem:[%s3715_s6 + $0x60] sm:$0xff] %v1536_v53  ;;  %v380_v44 = vadd.f32 1.0, %v1817_v49 }
 0x2b0   : > { %1553 = vst [vmem:[%s3715_s6 + $0x68] sm:$0xff] %v1537_v54  ;;  %v1819_v33 = vpop.eup %1818 }
 0x2b1   : > { %v1462_v36 = vpop.permute.xlu1 %1461  ;;  %v381_v1 = vadd.f32 1.0, %v1819_v33  ;;  %v396_v48 = vmul.f32 0.5, %v380_v44 }
 0x2b2   : > { %v1492_v35 = vmul.f32 %v1462_v36, %v1444_v23  ;;  %v1493_v19 = vmul.f32 %v1462_v36, %v1445_v28  ;;  %v1821_v10 = vpop.eup %1820 }
 0x2b3   : > { %v397_v62 = vmul.f32 0.5, %v381_v1  ;;  %v1823_v3 = vpop.eup %1822  ;;  %v384_v16 = vadd.f32 1.0, %v1821_v10 }
 0x2b4   : > { %v1508_v46 = vadd.f32 %v1492_v35, %v3590_v7  ;;  %v1509_v38 = vadd.f32 %v1493_v19, %v3593_v12  ;;  %v1450_v7 = vmul.f32 %v3679_v43, %v1429_v2  ;;  %v1451_v12 = vmul.f32 %v3684_v45, %v1437_v9 }
 0x2b5   : > { %v385_v51 = vadd.f32 1.0, %v1823_v3  ;;  %v400_v63 = vmul.f32 0.5, %v384_v16 }
 0x2b6   : > { %v1524_v30 = vmul.f32 %v1508_v46, %v390_v21  ;;  %v1525_v22 = vmul.f32 %v1509_v38, %v391_v60 }
 0x2b7   : > { %v401_v26 = vmul.f32 0.5, %v385_v51 }
 0x2b8   : > { %1540 = vst [vmem:[%s3715_s6] sm:$0xff] %v1524_v30 }
 0x2b9   : > { %1541 = vst [vmem:[%s3715_s6 + $0x8] sm:$0xff] %v1525_v22  ;;  %v1474_v52 = vpop.permute.xlu1 %1473 }
 0x2ba   : > { %v1498_v6 = vmul.f32 %v1474_v52, %v1450_v7  ;;  %v1499_v11 = vmul.f32 %v1474_v52, %v1451_v12 }
 0x2bc   : > { %v1514_v34 = vadd.f32 %v1498_v6, %v3646_v41  ;;  %v1515_v8 = vadd.f32 %v1499_v11, %v3649_v58  ;;  %v1454_v41 = vmul.f32 %v3679_v43, %v1431_v40  ;;  %v1455_v58 = vmul.f32 %v3684_v45, %v1439_v4 }
 0x2be   : > { %v1530_v61 = vmul.f32 %v1514_v34, %v396_v48  ;;  %v1531_v29 = vmul.f32 %v1515_v8, %v397_v62 }
 0x2c0   : > { %1546 = vst [vmem:[%s3715_s6 + $0x30] sm:$0xff] %v1530_v61 }
 0x2c1   : > { %1547 = vst [vmem:[%s3715_s6 + $0x38] sm:$0xff] %v1531_v29  ;;  %v1482_v50 = vpop.permute.xlu1 %1481 }
 0x2c2   : > { %v1502_v57 = vmul.f32 %v1482_v50, %v1454_v41  ;;  %v1503_v47 = vmul.f32 %v1482_v50, %v1455_v58 }
 0x2c4   : > { %v1518_v13 = vadd.f32 %v1502_v57, %v3566_v42  ;;  %v1519_v43 = vadd.f32 %v1503_v47, %v3569_v32 }
 0x2c6   : > { %v1534_v45 = vmul.f32 %v1518_v13, %v400_v63  ;;  %v1535_v27 = vmul.f32 %v1519_v43, %v401_v26 }
 0x2c8   : > { %1550 = vst [vmem:[%s3715_s6 + $0x50] sm:$0xff] %v1534_v45 }
 0x2c9   : > { %1551 = vst [vmem:[%s3715_s6 + $0x58] sm:$0xff] %v1535_v27 }
 0x2ca   : > { %1907 = shalt.err (!%p1904_p4)
}
 0x2cb   : > { %s1967_s7 = smov 256  }
 0x2cc   : > { %1699 = dma.vmem_to_hbm [thread:$0]  (%p2043_p11), %s1570_s30, 2048, %s1572_s19, %s1557_s5, %s1967_s7, %s1967_s7, %s1953_s13  }
 0x2cd PF: > { %s1586_s22 = sand.u32 1, %s1934_s15   ;;  %p4015_p7 = scmp.ge.s32.totalorder %s1946_s18, 2 }
 0x2ce   : > { %s1587_s6 = scalar_lea.sflag [#allocation4], %s1586_s22 }
 0x2cf   : > { %p1706_p5 = pnand %p4015_p7, %p2047_p12 }
 0x2d1   : > { %p1707_p8 = pneg %p1706_p5 }
 0x2d3   : > { %1929 = dma.done.wait (%p1707_p8), %s1587_s6, 2048  }
 0x2d4   : > { %1931 = vsyncadd (%p1707_p8), %s1587_s6, 4294965248  ;;  %p17_p10 = scmp.ge.s32.totalorder %s2018_s21, 4   ;;  %s4016_s15 = smov %s1938_s16 }
 0x2d5   : > { %s4017_s16 = smov %s1942_s17  ;;  %s4018_s17 = smov %s2030_s24 }
 0x2d6   : > { %s4019_s18 = smov %s2018_s21  ;;  %19 = sbr.rel (!%p17_p10) target bundleno = 5 (0x5), region = 81 }
 0x2db   :  { %1593 = vsyncpa [#allocation3], 1 }
 0x2dc   :  { %1595 = vsyncpa [#allocation3 + $0x1], 1 }
 0x2dd   :  { %1596 = vsyncpa [#allocation4], 1 }
 0x2de   :  { %1598 = vsyncpa [#allocation4 + $0x1], 1 }

</bundles_post_ra>
